<compile_context>
chip_gen: v6e
topology: v6e:2x2x1
jax: 0.10.0
libtpu: 0.0.40
codegen_flags: <defaults>
</compile_context>

<pallas_src>
import math
from functools import partial

import jax
import jax.numpy as jnp
from jax.experimental import pallas as pl
from jax.experimental.pallas import tpu as pltpu

# ----------------------------- configuration -------------------------------
CFG = dict(
    vocab_size=128,
    context_length=8,
    emb_dim=32,
    n_heads=4,
    n_layers=2,
    drop_rate=0.0,   # dropout is identity at inference
    qkv_bias=False,
)
EPS = 1e-5
GELU_C = math.sqrt(2.0 / math.pi)
LANE = 128
NEG_INF = -1e30


def _round_up(n, m):
    return (n + m - 1) // m * m


# ------------------------------- fused kernel -------------------------------
def gpt_kernel(x_ref, lane_mask_ref, head_mask_ref, bias_ref, sel_ref,
               wqkv_ref, bqkv_ref, wo_ref, bo_ref,
               w1_ref, b1_ref, w2_ref, b2_ref,
               wout_ref, bout_ref,
               out_ref, xn_ref, *, d_model, n_heads):
    f32 = jnp.float32
    bf16 = jnp.bfloat16
    D = d_model
    H = n_heads
    inv_d = f32(1.0 / D)

    def mm(a, w, bias=None):
        # bf16 MXU operands, f32 accumulation; element-wise math stays f32.
        r = jnp.dot(a.astype(bf16), w.astype(bf16), preferred_element_type=f32)
        if bias is not None:
            r = r + bias
        return r

    # ------------- transformer blocks: run once per batch block (v == 0) -----
    @pl.when(pl.program_id(1) == 0)
    def _():
        x = x_ref[...]                      # (BT, DP) f32; lanes >= D are zero
        BT, DP = x.shape
        lane_mask = lane_mask_ref[...]      # (1, DP)   real embedding lanes
        head_mask = head_mask_ref[...]      # (H*BT, DP) lane d belongs to head of row-block
        attn_bias = bias_ref[...]           # (H*BT, BT) 0 / -1e30 causal+batch mask
        sel = sel_ref[...]                  # (BT, H*BT) head-block collapse selector
        L = wqkv_ref.shape[0]

        def layer_norm(y):
            # affine already folded into the downstream weights at pack time;
            # stats are over the real D lanes only (pad lanes of y are zero).
            mean = jnp.sum(y, axis=-1, keepdims=True) * inv_d
            yc = y - mean
            var = jnp.sum(yc * yc * lane_mask, axis=-1, keepdims=True) * inv_d
            return yc * jax.lax.rsqrt(var + EPS)

        xx = x
        # TODO(synk): for n_layers >> 4, replace the static unroll with a layer
        # grid axis (weights indexed by the layer coordinate) to bound vreg live
        # ranges and per-step weight VMEM.
        for l in range(L):                  # static unroll (L = 2)
            # ---------------- multi-head causal self-attention ---------------
            xn = layer_norm(xx)
            qkv = mm(xn, wqkv_ref[l], bqkv_ref[l])          # (BT, 3*DP) fused QKV
            q = qkv[:, 0:DP]                                # 1/sqrt(Hd) folded into wq
            k = qkv[:, DP:2 * DP]
            v = qkv[:, 2 * DP:3 * DP]

            # head-blocked rows: row = h*BT + r carries head h's lanes of query r
            q_lhs = jnp.tile(q, (H, 1)) * head_mask         # (H*BT, DP)
            s = jax.lax.dot_general(
                q_lhs.astype(bf16), k.astype(bf16),
                (((1,), (1,)), ((), ())),
                preferred_element_type=f32) + attn_bias     # (H*BT, BT)

            # per-head softmax: max and denominator are plain per-row reductions
            p = jnp.exp(s - jnp.max(s, axis=-1, keepdims=True))
            p = p * pl.reciprocal(jnp.sum(p, axis=-1, keepdims=True), approx=True)

            ctx_blk = mm(p, v) * head_mask                  # (H*BT, DP)
            ctx = mm(sel, ctx_blk)                          # (BT, DP) head-concat layout
            xx = xx + mm(ctx, wo_ref[l], bo_ref[l])         # residual (dropout = id)

            # ------------------------- feed-forward --------------------------
            xn2 = layer_norm(xx)
            h = mm(xn2, w1_ref[l], b1_ref[l])               # (BT, 4D padded)
            h = 0.5 * h * (1.0 + jnp.tanh(GELU_C * (h + 0.044715 * h * h * h)))
            xx = xx + mm(h, w2_ref[l], b2_ref[l])           # residual (dropout = id)

        xn_ref[...] = layer_norm(xx)        # final LN (affine folded into wout/bout)

    # ------------------- output head: one vocab tile per step ----------------
    out_ref[...] = mm(xn_ref[...], wout_ref[...], bout_ref[...])


# ----------------------------- host-side packing -----------------------------
def _pad2d(w, rows, cols):
    out = jnp.zeros((rows, cols), jnp.float32)
    return out.at[:w.shape[0], :w.shape[1]].set(w)


def _pad_row(v, n):
    out = jnp.zeros((1, n), jnp.float32)
    return out.at[0, :v.shape[0]].set(v)


def _fold_ln(scale, shift, w, b=None):
    """Fold a LayerNorm affine into the downstream linear layer:
       (n(x)*scale + shift) @ w + b == n(x) @ (scale[:,None]*w) + (shift @ w + b)."""
    wf = scale[:, None] * w
    bf = shift @ w
    if b is not None:
        bf = bf + b
    return wf, bf


def pack_params(params, cfg):
    """Fold LN affines + q scale into weights, zero-pad to lane-dense shapes,
    fuse QKV, and stack per-layer weights."""
    D = cfg['emb_dim']
    V = cfg['vocab_size']
    H = cfg['n_heads']
    Hd = D // H
    DP = _round_up(D, LANE)
    FP = _round_up(4 * D, LANE)
    VP = _round_up(V, LANE)
    inv_sqrt_hd = 1.0 / math.sqrt(Hd)

    wqkv, bqkv, wo, bo, w1, b1, w2, b2 = ([] for _ in range(8))
    for lyr in params['layers']:
        # LN1 affine (+ 1/sqrt(head_dim) on q) folded into the fused QKV projection
        wq_f, bq_f = _fold_ln(lyr['ln1_scale'], lyr['ln1_shift'], lyr['wq'] * inv_sqrt_hd)
        wk_f, bk_f = _fold_ln(lyr['ln1_scale'], lyr['ln1_shift'], lyr['wk'])
        wv_f, bv_f = _fold_ln(lyr['ln1_scale'], lyr['ln1_shift'], lyr['wv'])
        fused_w = jnp.zeros((DP, 3 * DP), jnp.float32)
        fused_w = fused_w.at[:D, 0:D].set(wq_f)
        fused_w = fused_w.at[:D, DP:DP + D].set(wk_f)
        fused_w = fused_w.at[:D, 2 * DP:2 * DP + D].set(wv_f)
        fused_b = jnp.zeros((1, 3 * DP), jnp.float32)
        fused_b = fused_b.at[0, 0:D].set(bq_f)
        fused_b = fused_b.at[0, DP:DP + D].set(bk_f)
        fused_b = fused_b.at[0, 2 * DP:2 * DP + D].set(bv_f)
        wqkv.append(fused_w.astype(jnp.bfloat16))
        bqkv.append(fused_b)

        wo.append(_pad2d(lyr['wo'], DP, DP).astype(jnp.bfloat16))
        bo.append(_pad_row(lyr['bo'], DP))

        # LN2 affine folded into the first FF linear
        w1_f, b1_f = _fold_ln(lyr['ln2_scale'], lyr['ln2_shift'], lyr['w1'], lyr['b1'])
        w1.append(_pad2d(w1_f, DP, FP).astype(jnp.bfloat16))
        b1.append(_pad_row(b1_f, FP))
        w2.append(_pad2d(lyr['w2'], FP, DP).astype(jnp.bfloat16))
        b2.append(_pad_row(lyr['b2'], DP))

    # final LN affine folded into the output head
    wout_f, bout_f = _fold_ln(params['final_ln_scale'], params['final_ln_shift'],
                              params['w_out'])
    packed = dict(
        wqkv=jnp.stack(wqkv), bqkv=jnp.stack(bqkv),
        wo=jnp.stack(wo), bo=jnp.stack(bo),
        w1=jnp.stack(w1), b1=jnp.stack(b1),
        w2=jnp.stack(w2), b2=jnp.stack(b2),
        wout=_pad2d(wout_f, DP, VP).astype(jnp.bfloat16),
        bout=_pad_row(bout_f, VP),
    )
    return packed, DP, VP


def build_masks(BB, T, D, H, DP):
    """Host-precomputed attention constants (no in-kernel iota work)."""
    Hd = D // H
    BT = BB * T
    HT = H * BT
    row = jnp.arange(HT)                 # row = h*BT + (b*T + t)
    h_of_row = row // BT
    r_local = row % BT
    qb, qt = r_local // T, r_local % T
    col = jnp.arange(BT)                 # col = b'*T + s
    kb, ks = col // T, col % T

    # additive bias: keep iff same batch row AND causal (s <= t)
    attn_bias = jnp.where(
        (qb[:, None] == kb[None, :]) & (ks[None, :] <= qt[:, None]),
        0.0, NEG_INF).astype(jnp.float32)                          # (HT, BT)

    lane = jnp.arange(DP)
    # lane d belongs to head h; lanes >= D give d//Hd >= H so they stay zero
    head_mask = ((lane[None, :] // Hd) == h_of_row[:, None]).astype(jnp.float32)  # (HT, DP)

    # selector collapsing the H head blocks back to the (BT, DP) concat layout
    sel = (jnp.arange(BT)[:, None] == (jnp.arange(HT)[None, :] % BT)).astype(jnp.float32)

    lane_mask = (lane < D).astype(jnp.float32)[None, :]            # (1, DP)
    return lane_mask, head_mask, attn_bias, sel


def gpt_forward(in_idx, params, cfg, *, batch_blocks=1):
    # batch_blocks=1: whole batch in one grid step (best on 1-TC v5e/v6e).
    # On v7x with larger batches use batch_blocks=2 (one block per TensorCore).
    D = cfg['emb_dim']
    V = cfg['vocab_size']
    H = cfg['n_heads']
    B, T = in_idx.shape
    assert D % H == 0
    assert B % batch_blocks == 0
    BB = B // batch_blocks
    BT = BB * T
    assert BT % 8 == 0, "rows per block must be a multiple of 8 (sublanes)"

    packed, DP, VP = pack_params(params, cfg)
    lane_mask, head_mask, attn_bias, sel = build_masks(BB, T, D, H, DP)

    # token + position embedding (plain-JAX gather glue), zero-padded to DP lanes,
    # with the batch folded into the matmul M dimension.
    tok = jnp.take(params['tok_emb'], in_idx, axis=0)          # (B, T, D)
    x = tok + params['pos_emb'][:T][None, :, :]                # drop_emb = identity
    x = jnp.pad(x, ((0, 0), (0, 0), (0, DP - D))).astype(jnp.float32)
    x2d = x.reshape(B * T, DP)

    # vocab tiling for the output head (one tile at toy sizes; 256-512 at V~50k)
    TV = max(t for t in (512, 256, 128) if VP % t == 0)
    n_vt = VP // TV

    def const_spec(arr):
        nd = arr.ndim
        return pl.BlockSpec(arr.shape, lambda b, v, _nd=nd: (0,) * _nd)

    weights_const = [packed[k] for k in
                     ('wqkv', 'bqkv', 'wo', 'bo', 'w1', 'b1', 'w2', 'b2')]

    in_specs = ([pl.BlockSpec((BT, DP), lambda b, v: (b, 0))]
                + [const_spec(a) for a in (lane_mask, head_mask, attn_bias, sel)]
                + [const_spec(a) for a in weights_const]
                + [pl.BlockSpec((DP, TV), lambda b, v: (0, v)),
                   pl.BlockSpec((1, TV), lambda b, v: (0, v))])

    # TODO(synk): at realistic sizes, mark constant-index weight specs with
    # pipeline_mode=pl.Buffered(1) and set vmem_limit_bytes explicitly so the
    # resident weight slabs fit v7x's 64 MiB VMEM.
    logits2d = pl.pallas_call(
        partial(gpt_kernel, d_model=D, n_heads=H),
        grid=(batch_blocks, n_vt),
        out_shape=jax.ShapeDtypeStruct((B * T, VP), jnp.float32),
        in_specs=in_specs,
        out_specs=pl.BlockSpec((BT, TV), lambda b, v: (b, v)),
        scratch_shapes=[pltpu.VMEM((BT, DP), jnp.float32)],
        compiler_params=pltpu.CompilerParams(
            dimension_semantics=("parallel", "arbitrary")),
    )(x2d, lane_mask, head_mask, attn_bias, sel, *weights_const,
      packed['wout'], packed['bout'])

    return logits2d.reshape(B, T, VP)[..., :V]


# --------------------------- pure-JAX f32 reference --------------------------
def gpt_forward_reference(in_idx, params, cfg):
    D = cfg['emb_dim']
    H = cfg['n_heads']
    Hd = D // H
    B, T = in_idx.shape
    x = jnp.take(params['tok_emb'], in_idx, axis=0) + params['pos_emb'][:T][None]

    def ln(y, s, b):
        m = jnp.mean(y, axis=-1, keepdims=True)
        v = jnp.mean((y - m) ** 2, axis=-1, keepdims=True)
        return (y - m) / jnp.sqrt(v + EPS) * s + b

    causal = jnp.tril(jnp.ones((T, T), bool))
    for lyr in params['layers']:
        xn = ln(x, lyr['ln1_scale'], lyr['ln1_shift'])
        q = (xn @ lyr['wq']).reshape(B, T, H, Hd).transpose(0, 2, 1, 3)
        k = (xn @ lyr['wk']).reshape(B, T, H, Hd).transpose(0, 2, 1, 3)
        v = (xn @ lyr['wv']).reshape(B, T, H, Hd).transpose(0, 2, 1, 3)
        s = jnp.einsum('bhtd,bhsd->bhts', q, k) / math.sqrt(Hd)
        s = jnp.where(causal[None, None], s, -jnp.inf)
        p = jax.nn.softmax(s, axis=-1)
        ctx = jnp.einsum('bhts,bhsd->bhtd', p, v).transpose(0, 2, 1, 3).reshape(B, T, D)
        x = x + ctx @ lyr['wo'] + lyr['bo']
        xn2 = ln(x, lyr['ln2_scale'], lyr['ln2_shift'])
        h = xn2 @ lyr['w1'] + lyr['b1']
        h = 0.5 * h * (1.0 + jnp.tanh(GELU_C * (h + 0.044715 * h ** 3)))
        x = x + h @ lyr['w2'] + lyr['b2']
    xn = ln(x, params['final_ln_scale'], params['final_ln_shift'])
    return xn @ params['w_out']


# --------------------------- parameter creation ------------------------------
def init_params(cfg, key):
    D = cfg['emb_dim']
    V = cfg['vocab_size']
    C = cfg['context_length']

    def nrm(k, shape, std=0.02):
        return jax.random.normal(k, shape, dtype=jnp.float32) * std

    keys = jax.random.split(key, 3 + cfg['n_layers'])
    params = dict(
        tok_emb=nrm(keys[0], (V, D)),
        pos_emb=nrm(keys[1], (C, D)),
        final_ln_scale=jnp.ones((D,), jnp.float32),
        final_ln_shift=jnp.zeros((D,), jnp.float32),
        w_out=nrm(keys[2], (D, V)),
    )
    layers = []
    for li in range(cfg['n_layers']):
        lk = jax.random.split(keys[3 + li], 6)
        layers.append(dict(
            ln1_scale=jnp.ones((D,), jnp.float32),
            ln1_shift=jnp.zeros((D,), jnp.float32),
            wq=nrm(lk[0], (D, D)),
            wk=nrm(lk[1], (D, D)),
            wv=nrm(lk[2], (D, D)),
            wo=nrm(lk[3], (D, D)),
            bo=jnp.zeros((D,), jnp.float32),
            ln2_scale=jnp.ones((D,), jnp.float32),
            ln2_shift=jnp.zeros((D,), jnp.float32),
            w1=nrm(lk[4], (D, 4 * D)),
            b1=jnp.zeros((4 * D,), jnp.float32),
            w2=nrm(lk[5], (4 * D, D)),
            b2=jnp.zeros((D,), jnp.float32),
        ))
    params['layers'] = layers
    return params


# ---------------------------------- main -------------------------------------
if __name__ == "__main__":
    key = jax.random.PRNGKey(0)
    pkey, ikey = jax.random.split(key)
    params = init_params(CFG, pkey)

    B, T = 2, CFG['context_length']
    in_idx = jax.random.randint(ikey, (B, T), 0, CFG['vocab_size'], dtype=jnp.int32)

    logits = gpt_forward(in_idx, params, CFG)
    jax.block_until_ready(logits)
    assert logits.shape == (B, T, CFG['vocab_size'])
    assert bool(jnp.all(jnp.isfinite(logits)))

    # correctness check vs plain-JAX f32 reference (kernel uses bf16 matmul
    # operands + approx reciprocal, so allow a small tolerance)
    ref = gpt_forward_reference(in_idx, params, CFG)
    max_err = float(jnp.max(jnp.abs(logits - ref)))
    assert max_err < 3e-2, f"mismatch vs reference: {max_err}"

    print("KERNEL_OK")
</pallas_src>

<mosaic_0001>
module attributes {stable_mosaic.version = 11 : i64} {
  func.func @gpt_kernel(%arg0: i32, %arg1: i32, %arg2: memref<16x128xf32, #tpu.memory_space<vmem>>, %arg3: memref<1x128xf32, #tpu.memory_space<vmem>>, %arg4: memref<64x128xf32, #tpu.memory_space<vmem>>, %arg5: memref<64x16xf32, #tpu.memory_space<vmem>>, %arg6: memref<16x64xf32, #tpu.memory_space<vmem>>, %arg7: memref<2x128x384xbf16, #tpu.memory_space<vmem>>, %arg8: memref<2x1x384xf32, #tpu.memory_space<vmem>>, %arg9: memref<2x128x128xbf16, #tpu.memory_space<vmem>>, %arg10: memref<2x1x128xf32, #tpu.memory_space<vmem>>, %arg11: memref<2x128x128xbf16, #tpu.memory_space<vmem>>, %arg12: memref<2x1x128xf32, #tpu.memory_space<vmem>>, %arg13: memref<2x128x128xbf16, #tpu.memory_space<vmem>>, %arg14: memref<2x1x128xf32, #tpu.memory_space<vmem>>, %arg15: memref<128x128xbf16, #tpu.memory_space<vmem>>, %arg16: memref<1x128xf32, #tpu.memory_space<vmem>>, %arg17: memref<16x128xf32, #tpu.memory_space<vmem>>, %arg18: memref<16x128xf32, #tpu.memory_space<vmem>>) attributes {dimension_semantics = [#tpu.dimension_semantics<parallel>, #tpu.dimension_semantics<arbitrary>], iteration_bounds = array<i64: 1, 1>, scalar_prefetch = 0 : i64, scratch_operands = 1 : i64, tpu.core_type = #tpu.core_type<tc>, window_params = [{transform_indices = @transform_0, window_bounds = array<i64: 16, 128>}, {pipeline_mode = #tpu.pipeline_mode<synchronous>, transform_indices = @transform_1, window_bounds = array<i64: 1, 128>}, {pipeline_mode = #tpu.pipeline_mode<synchronous>, transform_indices = @transform_2, window_bounds = array<i64: 64, 128>}, {pipeline_mode = #tpu.pipeline_mode<synchronous>, transform_indices = @transform_3, window_bounds = array<i64: 64, 16>}, {pipeline_mode = #tpu.pipeline_mode<synchronous>, transform_indices = @transform_4, window_bounds = array<i64: 16, 64>}, {pipeline_mode = #tpu.pipeline_mode<synchronous>, transform_indices = @transform_5, window_bounds = array<i64: 2, 128, 384>}, {pipeline_mode = #tpu.pipeline_mode<synchronous>, transform_indices = @transform_6, window_bounds = array<i64: 2, 1, 384>}, {pipeline_mode = #tpu.pipeline_mode<synchronous>, transform_indices = @transform_7, window_bounds = array<i64: 2, 128, 128>}, {pipeline_mode = #tpu.pipeline_mode<synchronous>, transform_indices = @transform_8, window_bounds = array<i64: 2, 1, 128>}, {pipeline_mode = #tpu.pipeline_mode<synchronous>, transform_indices = @transform_9, window_bounds = array<i64: 2, 128, 128>}, {pipeline_mode = #tpu.pipeline_mode<synchronous>, transform_indices = @transform_10, window_bounds = array<i64: 2, 1, 128>}, {pipeline_mode = #tpu.pipeline_mode<synchronous>, transform_indices = @transform_11, window_bounds = array<i64: 2, 128, 128>}, {pipeline_mode = #tpu.pipeline_mode<synchronous>, transform_indices = @transform_12, window_bounds = array<i64: 2, 1, 128>}, {transform_indices = @transform_13, window_bounds = array<i64: 128, 128>}, {transform_indices = @transform_14, window_bounds = array<i64: 1, 128>}, {transform_indices = @transform_15, window_bounds = array<i64: 16, 128>}]} {
    %c0_i32 = arith.constant 0 : i32
    %0 = arith.cmpi eq, %arg1, %c0_i32 : i32
    %1 = arith.extui %0 : i1 to i32
    %cst = arith.constant 3.125000e-02 : f32
    %c0_i32_0 = arith.constant 0 : i32
    %2 = arith.cmpi ne, %1, %c0_i32_0 : i32
    scf.if %2 {
      %c0_9 = arith.constant 0 : index
      %c0_10 = arith.constant 0 : index
      %11 = vector.load %arg2[%c0_9, %c0_10] : memref<16x128xf32, #tpu.memory_space<vmem>>, vector<16x128xf32>
      %c0_11 = arith.constant 0 : index
      %c0_12 = arith.constant 0 : index
      %12 = vector.load %arg3[%c0_11, %c0_12] : memref<1x128xf32, #tpu.memory_space<vmem>>, vector<1x128xf32>
      %c0_13 = arith.constant 0 : index
      %c0_14 = arith.constant 0 : index
      %13 = vector.load %arg4[%c0_13, %c0_14] : memref<64x128xf32, #tpu.memory_space<vmem>>, vector<64x128xf32>
      %c0_15 = arith.constant 0 : index
      %c0_16 = arith.constant 0 : index
      %14 = vector.load %arg5[%c0_15, %c0_16] : memref<64x16xf32, #tpu.memory_space<vmem>>, vector<64x16xf32>
      %c0_17 = arith.constant 0 : index
      %c0_18 = arith.constant 0 : index
      %15 = vector.load %arg6[%c0_17, %c0_18] : memref<16x64xf32, #tpu.memory_space<vmem>>, vector<16x64xf32>
      %cst_19 = arith.constant dense<0.000000e+00> : vector<16xf32>
      %16 = vector.multi_reduction <add>, %11, %cst_19 [1] : vector<16x128xf32> to vector<16xf32>
      %17 = vector.shape_cast %16 : vector<16xf32> to vector<16x1xf32>
      %18 = vector.broadcast %cst : f32 to vector<16x1xf32>
      %19 = arith.mulf %17, %18 : vector<16x1xf32>
      %20 = vector.broadcast %19 : vector<16x1xf32> to vector<16x128xf32>
      %21 = arith.subf %11, %20 : vector<16x128xf32>
      %22 = arith.mulf %21, %21 : vector<16x128xf32>
      %23 = vector.broadcast %12 : vector<1x128xf32> to vector<16x128xf32>
      %24 = arith.mulf %22, %23 : vector<16x128xf32>
      %cst_20 = arith.constant dense<0.000000e+00> : vector<16xf32>
      %25 = vector.multi_reduction <add>, %24, %cst_20 [1] : vector<16x128xf32> to vector<16xf32>
      %26 = vector.shape_cast %25 : vector<16xf32> to vector<16x1xf32>
      %27 = vector.broadcast %cst : f32 to vector<16x1xf32>
      %28 = arith.mulf %26, %27 : vector<16x1xf32>
      %cst_21 = arith.constant 9.99999974E-6 : f32
      %29 = vector.broadcast %cst_21 : f32 to vector<16x1xf32>
      %30 = arith.addf %28, %29 : vector<16x1xf32>
      %31 = math.rsqrt %30 : vector<16x1xf32>
      %32 = vector.broadcast %31 : vector<16x1xf32> to vector<16x128xf32>
      %33 = arith.mulf %21, %32 : vector<16x128xf32>
      %c0_22 = arith.constant 0 : index
      %c0_23 = arith.constant 0 : index
      %c0_24 = arith.constant 0 : index
      %34 = vector.load %arg7[%c0_22, %c0_23, %c0_24] : memref<2x128x384xbf16, #tpu.memory_space<vmem>>, vector<1x128x384xbf16>
      %35 = vector.shape_cast %34 : vector<1x128x384xbf16> to vector<128x384xbf16>
      %c0_25 = arith.constant 0 : index
      %c0_26 = arith.constant 0 : index
      %c0_27 = arith.constant 0 : index
      %36 = vector.load %arg8[%c0_25, %c0_26, %c0_27] : memref<2x1x384xf32, #tpu.memory_space<vmem>>, vector<1x1x384xf32>
      %37 = vector.shape_cast %36 : vector<1x1x384xf32> to vector<1x384xf32>
      %38 = arith.truncf %33 : vector<16x128xf32> to vector<16x128xbf16>
      %cst_28 = arith.constant dense<0.000000e+00> : vector<16x384xf32>
      %39 = tpu.matmul %38, %35, %cst_28 {dimension_numbers = #tpu.dot_dimension_numbers<[1], [0], [0], [1], [0, 0, 1, 1], [], []>} : vector<16x128xbf16>, vector<128x384xbf16>, vector<16x384xf32> -> vector<16x384xf32>
      %40 = vector.broadcast %37 : vector<1x384xf32> to vector<16x384xf32>
      %41 = arith.addf %39, %40 : vector<16x384xf32>
      %42 = vector.extract_strided_slice %41 {offsets = [0, 0], sizes = [16, 128], strides = [1, 1]} : vector<16x384xf32> to vector<16x128xf32>
      %43 = vector.extract_strided_slice %41 {offsets = [0, 128], sizes = [16, 128], strides = [1, 1]} : vector<16x384xf32> to vector<16x128xf32>
      %44 = vector.extract_strided_slice %41 {offsets = [0, 256], sizes = [16, 128], strides = [1, 1]} : vector<16x384xf32> to vector<16x128xf32>
      %45 = tpu.concatenate %42, %42, %42, %42 in 0 : vector<16x128xf32>, vector<16x128xf32>, vector<16x128xf32>, vector<16x128xf32> -> vector<64x128xf32>
      %46 = arith.mulf %45, %13 : vector<64x128xf32>
      %47 = arith.truncf %46 : vector<64x128xf32> to vector<64x128xbf16>
      %48 = arith.truncf %43 : vector<16x128xf32> to vector<16x128xbf16>
      %cst_29 = arith.constant dense<0.000000e+00> : vector<64x16xf32>
      %49 = tpu.matmul %47, %48, %cst_29 {dimension_numbers = #tpu.dot_dimension_numbers<[1], [1], [0], [0], [0, 0, 1, 0], [], []>} : vector<64x128xbf16>, vector<16x128xbf16>, vector<64x16xf32> -> vector<64x16xf32>
      %50 = arith.addf %49, %14 : vector<64x16xf32>
      %cst_30 = arith.constant dense<0xFF800000> : vector<64xf32>
      %51 = vector.multi_reduction <maximumf>, %50, %cst_30 [1] : vector<64x16xf32> to vector<64xf32>
      %52 = vector.shape_cast %51 : vector<64xf32> to vector<64x1xf32>
      %53 = vector.broadcast %52 : vector<64x1xf32> to vector<64x16xf32>
      %54 = arith.subf %50, %53 : vector<64x16xf32>
      %55 = math.exp %54 : vector<64x16xf32>
      %cst_31 = arith.constant dense<0.000000e+00> : vector<64xf32>
      %56 = vector.multi_reduction <add>, %55, %cst_31 [1] : vector<64x16xf32> to vector<64xf32>
      %57 = vector.shape_cast %56 : vector<64xf32> to vector<64x1xf32>
      %58 = tpu.reciprocal %57 {approx = true} : vector<64x1xf32> -> vector<64x1xf32>
      %59 = vector.broadcast %58 : vector<64x1xf32> to vector<64x16xf32>
      %60 = arith.mulf %55, %59 : vector<64x16xf32>
      %61 = arith.truncf %60 : vector<64x16xf32> to vector<64x16xbf16>
      %62 = arith.truncf %44 : vector<16x128xf32> to vector<16x128xbf16>
      %cst_32 = arith.constant dense<0.000000e+00> : vector<64x128xf32>
      %63 = tpu.matmul %61, %62, %cst_32 {dimension_numbers = #tpu.dot_dimension_numbers<[1], [0], [0], [1], [0, 0, 1, 1], [], []>} : vector<64x16xbf16>, vector<16x128xbf16>, vector<64x128xf32> -> vector<64x128xf32>
      %64 = arith.mulf %63, %13 : vector<64x128xf32>
      %65 = arith.truncf %15 : vector<16x64xf32> to vector<16x64xbf16>
      %66 = arith.truncf %64 : vector<64x128xf32> to vector<64x128xbf16>
      %cst_33 = arith.constant dense<0.000000e+00> : vector<16x128xf32>
      %67 = tpu.matmul %65, %66, %cst_33 {dimension_numbers = #tpu.dot_dimension_numbers<[1], [0], [0], [1], [0, 0, 1, 1], [], []>} : vector<16x64xbf16>, vector<64x128xbf16>, vector<16x128xf32> -> vector<16x128xf32>
      %c0_34 = arith.constant 0 : index
      %c0_35 = arith.constant 0 : index
      %c0_36 = arith.constant 0 : index
      %68 = vector.load %arg9[%c0_34, %c0_35, %c0_36] : memref<2x128x128xbf16, #tpu.memory_space<vmem>>, vector<1x128x128xbf16>
      %69 = vector.shape_cast %68 : vector<1x128x128xbf16> to vector<128x128xbf16>
      %c0_37 = arith.constant 0 : index
      %c0_38 = arith.constant 0 : index
      %c0_39 = arith.constant 0 : index
      %70 = vector.load %arg10[%c0_37, %c0_38, %c0_39] : memref<2x1x128xf32, #tpu.memory_space<vmem>>, vector<1x1x128xf32>
      %71 = vector.shape_cast %70 : vector<1x1x128xf32> to vector<1x128xf32>
      %72 = arith.truncf %67 : vector<16x128xf32> to vector<16x128xbf16>
      %cst_40 = arith.constant dense<0.000000e+00> : vector<16x128xf32>
      %73 = tpu.matmul %72, %69, %cst_40 {dimension_numbers = #tpu.dot_dimension_numbers<[1], [0], [0], [1], [0, 0, 1, 1], [], []>} : vector<16x128xbf16>, vector<128x128xbf16>, vector<16x128xf32> -> vector<16x128xf32>
      %74 = vector.broadcast %71 : vector<1x128xf32> to vector<16x128xf32>
      %75 = arith.addf %73, %74 : vector<16x128xf32>
      %76 = arith.addf %11, %75 : vector<16x128xf32>
      %cst_41 = arith.constant dense<0.000000e+00> : vector<16xf32>
      %77 = vector.multi_reduction <add>, %76, %cst_41 [1] : vector<16x128xf32> to vector<16xf32>
      %78 = vector.shape_cast %77 : vector<16xf32> to vector<16x1xf32>
      %79 = vector.broadcast %cst : f32 to vector<16x1xf32>
      %80 = arith.mulf %78, %79 : vector<16x1xf32>
      %81 = vector.broadcast %80 : vector<16x1xf32> to vector<16x128xf32>
      %82 = arith.subf %76, %81 : vector<16x128xf32>
      %83 = arith.mulf %82, %82 : vector<16x128xf32>
      %84 = vector.broadcast %12 : vector<1x128xf32> to vector<16x128xf32>
      %85 = arith.mulf %83, %84 : vector<16x128xf32>
      %cst_42 = arith.constant dense<0.000000e+00> : vector<16xf32>
      %86 = vector.multi_reduction <add>, %85, %cst_42 [1] : vector<16x128xf32> to vector<16xf32>
      %87 = vector.shape_cast %86 : vector<16xf32> to vector<16x1xf32>
      %88 = vector.broadcast %cst : f32 to vector<16x1xf32>
      %89 = arith.mulf %87, %88 : vector<16x1xf32>
      %cst_43 = arith.constant 9.99999974E-6 : f32
      %90 = vector.broadcast %cst_43 : f32 to vector<16x1xf32>
      %91 = arith.addf %89, %90 : vector<16x1xf32>
      %92 = math.rsqrt %91 : vector<16x1xf32>
      %93 = vector.broadcast %92 : vector<16x1xf32> to vector<16x128xf32>
      %94 = arith.mulf %82, %93 : vector<16x128xf32>
      %c0_44 = arith.constant 0 : index
      %c0_45 = arith.constant 0 : index
      %c0_46 = arith.constant 0 : index
      %95 = vector.load %arg11[%c0_44, %c0_45, %c0_46] : memref<2x128x128xbf16, #tpu.memory_space<vmem>>, vector<1x128x128xbf16>
      %96 = vector.shape_cast %95 : vector<1x128x128xbf16> to vector<128x128xbf16>
      %c0_47 = arith.constant 0 : index
      %c0_48 = arith.constant 0 : index
      %c0_49 = arith.constant 0 : index
      %97 = vector.load %arg12[%c0_47, %c0_48, %c0_49] : memref<2x1x128xf32, #tpu.memory_space<vmem>>, vector<1x1x128xf32>
      %98 = vector.shape_cast %97 : vector<1x1x128xf32> to vector<1x128xf32>
      %99 = arith.truncf %94 : vector<16x128xf32> to vector<16x128xbf16>
      %cst_50 = arith.constant dense<0.000000e+00> : vector<16x128xf32>
      %100 = tpu.matmul %99, %96, %cst_50 {dimension_numbers = #tpu.dot_dimension_numbers<[1], [0], [0], [1], [0, 0, 1, 1], [], []>} : vector<16x128xbf16>, vector<128x128xbf16>, vector<16x128xf32> -> vector<16x128xf32>
      %101 = vector.broadcast %98 : vector<1x128xf32> to vector<16x128xf32>
      %102 = arith.addf %100, %101 : vector<16x128xf32>
      %cst_51 = arith.constant 5.000000e-01 : f32
      %103 = vector.broadcast %cst_51 : f32 to vector<16x128xf32>
      %104 = arith.mulf %103, %102 : vector<16x128xf32>
      %cst_52 = arith.constant 4.471500e-02 : f32
      %105 = vector.broadcast %cst_52 : f32 to vector<16x128xf32>
      %106 = arith.mulf %105, %102 : vector<16x128xf32>
      %107 = arith.mulf %106, %102 : vector<16x128xf32>
      %108 = arith.mulf %107, %102 : vector<16x128xf32>
      %109 = arith.addf %102, %108 : vector<16x128xf32>
      %cst_53 = arith.constant 0.797884583 : f32
      %110 = vector.broadcast %cst_53 : f32 to vector<16x128xf32>
      %111 = arith.mulf %110, %109 : vector<16x128xf32>
      %112 = math.tanh %111 : vector<16x128xf32>
      %cst_54 = arith.constant 1.000000e+00 : f32
      %113 = vector.broadcast %cst_54 : f32 to vector<16x128xf32>
      %114 = arith.addf %113, %112 : vector<16x128xf32>
      %115 = arith.mulf %104, %114 : vector<16x128xf32>
      %c0_55 = arith.constant 0 : index
      %c0_56 = arith.constant 0 : index
      %c0_57 = arith.constant 0 : index
      %116 = vector.load %arg13[%c0_55, %c0_56, %c0_57] : memref<2x128x128xbf16, #tpu.memory_space<vmem>>, vector<1x128x128xbf16>
      %117 = vector.shape_cast %116 : vector<1x128x128xbf16> to vector<128x128xbf16>
      %c0_58 = arith.constant 0 : index
      %c0_59 = arith.constant 0 : index
      %c0_60 = arith.constant 0 : index
      %118 = vector.load %arg14[%c0_58, %c0_59, %c0_60] : memref<2x1x128xf32, #tpu.memory_space<vmem>>, vector<1x1x128xf32>
      %119 = vector.shape_cast %118 : vector<1x1x128xf32> to vector<1x128xf32>
      %120 = arith.truncf %115 : vector<16x128xf32> to vector<16x128xbf16>
      %cst_61 = arith.constant dense<0.000000e+00> : vector<16x128xf32>
      %121 = tpu.matmul %120, %117, %cst_61 {dimension_numbers = #tpu.dot_dimension_numbers<[1], [0], [0], [1], [0, 0, 1, 1], [], []>} : vector<16x128xbf16>, vector<128x128xbf16>, vector<16x128xf32> -> vector<16x128xf32>
      %122 = vector.broadcast %119 : vector<1x128xf32> to vector<16x128xf32>
      %123 = arith.addf %121, %122 : vector<16x128xf32>
      %124 = arith.addf %76, %123 : vector<16x128xf32>
      %cst_62 = arith.constant dense<0.000000e+00> : vector<16xf32>
      %125 = vector.multi_reduction <add>, %124, %cst_62 [1] : vector<16x128xf32> to vector<16xf32>
      %126 = vector.shape_cast %125 : vector<16xf32> to vector<16x1xf32>
      %127 = vector.broadcast %cst : f32 to vector<16x1xf32>
      %128 = arith.mulf %126, %127 : vector<16x1xf32>
      %129 = vector.broadcast %128 : vector<16x1xf32> to vector<16x128xf32>
      %130 = arith.subf %124, %129 : vector<16x128xf32>
      %131 = arith.mulf %130, %130 : vector<16x128xf32>
      %132 = vector.broadcast %12 : vector<1x128xf32> to vector<16x128xf32>
      %133 = arith.mulf %131, %132 : vector<16x128xf32>
      %cst_63 = arith.constant dense<0.000000e+00> : vector<16xf32>
      %134 = vector.multi_reduction <add>, %133, %cst_63 [1] : vector<16x128xf32> to vector<16xf32>
      %135 = vector.shape_cast %134 : vector<16xf32> to vector<16x1xf32>
      %136 = vector.broadcast %cst : f32 to vector<16x1xf32>
      %137 = arith.mulf %135, %136 : vector<16x1xf32>
      %cst_64 = arith.constant 9.99999974E-6 : f32
      %138 = vector.broadcast %cst_64 : f32 to vector<16x1xf32>
      %139 = arith.addf %137, %138 : vector<16x1xf32>
      %140 = math.rsqrt %139 : vector<16x1xf32>
      %141 = vector.broadcast %140 : vector<16x1xf32> to vector<16x128xf32>
      %142 = arith.mulf %130, %141 : vector<16x128xf32>
      %c1 = arith.constant 1 : index
      %c0_65 = arith.constant 0 : index
      %c0_66 = arith.constant 0 : index
      %143 = vector.load %arg7[%c1, %c0_65, %c0_66] : memref<2x128x384xbf16, #tpu.memory_space<vmem>>, vector<1x128x384xbf16>
      %144 = vector.shape_cast %143 : vector<1x128x384xbf16> to vector<128x384xbf16>
      %c1_67 = arith.constant 1 : index
      %c0_68 = arith.constant 0 : index
      %c0_69 = arith.constant 0 : index
      %145 = vector.load %arg8[%c1_67, %c0_68, %c0_69] : memref<2x1x384xf32, #tpu.memory_space<vmem>>, vector<1x1x384xf32>
      %146 = vector.shape_cast %145 : vector<1x1x384xf32> to vector<1x384xf32>
      %147 = arith.truncf %142 : vector<16x128xf32> to vector<16x128xbf16>
      %cst_70 = arith.constant dense<0.000000e+00> : vector<16x384xf32>
      %148 = tpu.matmul %147, %144, %cst_70 {dimension_numbers = #tpu.dot_dimension_numbers<[1], [0], [0], [1], [0, 0, 1, 1], [], []>} : vector<16x128xbf16>, vector<128x384xbf16>, vector<16x384xf32> -> vector<16x384xf32>
      %149 = vector.broadcast %146 : vector<1x384xf32> to vector<16x384xf32>
      %150 = arith.addf %148, %149 : vector<16x384xf32>
      %151 = vector.extract_strided_slice %150 {offsets = [0, 0], sizes = [16, 128], strides = [1, 1]} : vector<16x384xf32> to vector<16x128xf32>
      %152 = vector.extract_strided_slice %150 {offsets = [0, 128], sizes = [16, 128], strides = [1, 1]} : vector<16x384xf32> to vector<16x128xf32>
      %153 = vector.extract_strided_slice %150 {offsets = [0, 256], sizes = [16, 128], strides = [1, 1]} : vector<16x384xf32> to vector<16x128xf32>
      %154 = tpu.concatenate %151, %151, %151, %151 in 0 : vector<16x128xf32>, vector<16x128xf32>, vector<16x128xf32>, vector<16x128xf32> -> vector<64x128xf32>
      %155 = arith.mulf %154, %13 : vector<64x128xf32>
      %156 = arith.truncf %155 : vector<64x128xf32> to vector<64x128xbf16>
      %157 = arith.truncf %152 : vector<16x128xf32> to vector<16x128xbf16>
      %cst_71 = arith.constant dense<0.000000e+00> : vector<64x16xf32>
      %158 = tpu.matmul %156, %157, %cst_71 {dimension_numbers = #tpu.dot_dimension_numbers<[1], [1], [0], [0], [0, 0, 1, 0], [], []>} : vector<64x128xbf16>, vector<16x128xbf16>, vector<64x16xf32> -> vector<64x16xf32>
      %159 = arith.addf %158, %14 : vector<64x16xf32>
      %cst_72 = arith.constant dense<0xFF800000> : vector<64xf32>
      %160 = vector.multi_reduction <maximumf>, %159, %cst_72 [1] : vector<64x16xf32> to vector<64xf32>
      %161 = vector.shape_cast %160 : vector<64xf32> to vector<64x1xf32>
      %162 = vector.broadcast %161 : vector<64x1xf32> to vector<64x16xf32>
      %163 = arith.subf %159, %162 : vector<64x16xf32>
      %164 = math.exp %163 : vector<64x16xf32>
      %cst_73 = arith.constant dense<0.000000e+00> : vector<64xf32>
      %165 = vector.multi_reduction <add>, %164, %cst_73 [1] : vector<64x16xf32> to vector<64xf32>
      %166 = vector.shape_cast %165 : vector<64xf32> to vector<64x1xf32>
      %167 = tpu.reciprocal %166 {approx = true} : vector<64x1xf32> -> vector<64x1xf32>
      %168 = vector.broadcast %167 : vector<64x1xf32> to vector<64x16xf32>
      %169 = arith.mulf %164, %168 : vector<64x16xf32>
      %170 = arith.truncf %169 : vector<64x16xf32> to vector<64x16xbf16>
      %171 = arith.truncf %153 : vector<16x128xf32> to vector<16x128xbf16>
      %cst_74 = arith.constant dense<0.000000e+00> : vector<64x128xf32>
      %172 = tpu.matmul %170, %171, %cst_74 {dimension_numbers = #tpu.dot_dimension_numbers<[1], [0], [0], [1], [0, 0, 1, 1], [], []>} : vector<64x16xbf16>, vector<16x128xbf16>, vector<64x128xf32> -> vector<64x128xf32>
      %173 = arith.mulf %172, %13 : vector<64x128xf32>
      %174 = arith.truncf %15 : vector<16x64xf32> to vector<16x64xbf16>
      %175 = arith.truncf %173 : vector<64x128xf32> to vector<64x128xbf16>
      %cst_75 = arith.constant dense<0.000000e+00> : vector<16x128xf32>
      %176 = tpu.matmul %174, %175, %cst_75 {dimension_numbers = #tpu.dot_dimension_numbers<[1], [0], [0], [1], [0, 0, 1, 1], [], []>} : vector<16x64xbf16>, vector<64x128xbf16>, vector<16x128xf32> -> vector<16x128xf32>
      %c1_76 = arith.constant 1 : index
      %c0_77 = arith.constant 0 : index
      %c0_78 = arith.constant 0 : index
      %177 = vector.load %arg9[%c1_76, %c0_77, %c0_78] : memref<2x128x128xbf16, #tpu.memory_space<vmem>>, vector<1x128x128xbf16>
      %178 = vector.shape_cast %177 : vector<1x128x128xbf16> to vector<128x128xbf16>
      %c1_79 = arith.constant 1 : index
      %c0_80 = arith.constant 0 : index
      %c0_81 = arith.constant 0 : index
      %179 = vector.load %arg10[%c1_79, %c0_80, %c0_81] : memref<2x1x128xf32, #tpu.memory_space<vmem>>, vector<1x1x128xf32>
      %180 = vector.shape_cast %179 : vector<1x1x128xf32> to vector<1x128xf32>
      %181 = arith.truncf %176 : vector<16x128xf32> to vector<16x128xbf16>
      %cst_82 = arith.constant dense<0.000000e+00> : vector<16x128xf32>
      %182 = tpu.matmul %181, %178, %cst_82 {dimension_numbers = #tpu.dot_dimension_numbers<[1], [0], [0], [1], [0, 0, 1, 1], [], []>} : vector<16x128xbf16>, vector<128x128xbf16>, vector<16x128xf32> -> vector<16x128xf32>
      %183 = vector.broadcast %180 : vector<1x128xf32> to vector<16x128xf32>
      %184 = arith.addf %182, %183 : vector<16x128xf32>
      %185 = arith.addf %124, %184 : vector<16x128xf32>
      %cst_83 = arith.constant dense<0.000000e+00> : vector<16xf32>
      %186 = vector.multi_reduction <add>, %185, %cst_83 [1] : vector<16x128xf32> to vector<16xf32>
      %187 = vector.shape_cast %186 : vector<16xf32> to vector<16x1xf32>
      %188 = vector.broadcast %cst : f32 to vector<16x1xf32>
      %189 = arith.mulf %187, %188 : vector<16x1xf32>
      %190 = vector.broadcast %189 : vector<16x1xf32> to vector<16x128xf32>
      %191 = arith.subf %185, %190 : vector<16x128xf32>
      %192 = arith.mulf %191, %191 : vector<16x128xf32>
      %193 = vector.broadcast %12 : vector<1x128xf32> to vector<16x128xf32>
      %194 = arith.mulf %192, %193 : vector<16x128xf32>
      %cst_84 = arith.constant dense<0.000000e+00> : vector<16xf32>
      %195 = vector.multi_reduction <add>, %194, %cst_84 [1] : vector<16x128xf32> to vector<16xf32>
      %196 = vector.shape_cast %195 : vector<16xf32> to vector<16x1xf32>
      %197 = vector.broadcast %cst : f32 to vector<16x1xf32>
      %198 = arith.mulf %196, %197 : vector<16x1xf32>
      %cst_85 = arith.constant 9.99999974E-6 : f32
      %199 = vector.broadcast %cst_85 : f32 to vector<16x1xf32>
      %200 = arith.addf %198, %199 : vector<16x1xf32>
      %201 = math.rsqrt %200 : vector<16x1xf32>
      %202 = vector.broadcast %201 : vector<16x1xf32> to vector<16x128xf32>
      %203 = arith.mulf %191, %202 : vector<16x128xf32>
      %c1_86 = arith.constant 1 : index
      %c0_87 = arith.constant 0 : index
      %c0_88 = arith.constant 0 : index
      %204 = vector.load %arg11[%c1_86, %c0_87, %c0_88] : memref<2x128x128xbf16, #tpu.memory_space<vmem>>, vector<1x128x128xbf16>
      %205 = vector.shape_cast %204 : vector<1x128x128xbf16> to vector<128x128xbf16>
      %c1_89 = arith.constant 1 : index
      %c0_90 = arith.constant 0 : index
      %c0_91 = arith.constant 0 : index
      %206 = vector.load %arg12[%c1_89, %c0_90, %c0_91] : memref<2x1x128xf32, #tpu.memory_space<vmem>>, vector<1x1x128xf32>
      %207 = vector.shape_cast %206 : vector<1x1x128xf32> to vector<1x128xf32>
      %208 = arith.truncf %203 : vector<16x128xf32> to vector<16x128xbf16>
      %cst_92 = arith.constant dense<0.000000e+00> : vector<16x128xf32>
      %209 = tpu.matmul %208, %205, %cst_92 {dimension_numbers = #tpu.dot_dimension_numbers<[1], [0], [0], [1], [0, 0, 1, 1], [], []>} : vector<16x128xbf16>, vector<128x128xbf16>, vector<16x128xf32> -> vector<16x128xf32>
      %210 = vector.broadcast %207 : vector<1x128xf32> to vector<16x128xf32>
      %211 = arith.addf %209, %210 : vector<16x128xf32>
      %cst_93 = arith.constant 5.000000e-01 : f32
      %212 = vector.broadcast %cst_93 : f32 to vector<16x128xf32>
      %213 = arith.mulf %212, %211 : vector<16x128xf32>
      %cst_94 = arith.constant 4.471500e-02 : f32
      %214 = vector.broadcast %cst_94 : f32 to vector<16x128xf32>
      %215 = arith.mulf %214, %211 : vector<16x128xf32>
      %216 = arith.mulf %215, %211 : vector<16x128xf32>
      %217 = arith.mulf %216, %211 : vector<16x128xf32>
      %218 = arith.addf %211, %217 : vector<16x128xf32>
      %cst_95 = arith.constant 0.797884583 : f32
      %219 = vector.broadcast %cst_95 : f32 to vector<16x128xf32>
      %220 = arith.mulf %219, %218 : vector<16x128xf32>
      %221 = math.tanh %220 : vector<16x128xf32>
      %cst_96 = arith.constant 1.000000e+00 : f32
      %222 = vector.broadcast %cst_96 : f32 to vector<16x128xf32>
      %223 = arith.addf %222, %221 : vector<16x128xf32>
      %224 = arith.mulf %213, %223 : vector<16x128xf32>
      %c1_97 = arith.constant 1 : index
      %c0_98 = arith.constant 0 : index
      %c0_99 = arith.constant 0 : index
      %225 = vector.load %arg13[%c1_97, %c0_98, %c0_99] : memref<2x128x128xbf16, #tpu.memory_space<vmem>>, vector<1x128x128xbf16>
      %226 = vector.shape_cast %225 : vector<1x128x128xbf16> to vector<128x128xbf16>
      %c1_100 = arith.constant 1 : index
      %c0_101 = arith.constant 0 : index
      %c0_102 = arith.constant 0 : index
      %227 = vector.load %arg14[%c1_100, %c0_101, %c0_102] : memref<2x1x128xf32, #tpu.memory_space<vmem>>, vector<1x1x128xf32>
      %228 = vector.shape_cast %227 : vector<1x1x128xf32> to vector<1x128xf32>
      %229 = arith.truncf %224 : vector<16x128xf32> to vector<16x128xbf16>
      %cst_103 = arith.constant dense<0.000000e+00> : vector<16x128xf32>
      %230 = tpu.matmul %229, %226, %cst_103 {dimension_numbers = #tpu.dot_dimension_numbers<[1], [0], [0], [1], [0, 0, 1, 1], [], []>} : vector<16x128xbf16>, vector<128x128xbf16>, vector<16x128xf32> -> vector<16x128xf32>
      %231 = vector.broadcast %228 : vector<1x128xf32> to vector<16x128xf32>
      %232 = arith.addf %230, %231 : vector<16x128xf32>
      %233 = arith.addf %185, %232 : vector<16x128xf32>
      %cst_104 = arith.constant dense<0.000000e+00> : vector<16xf32>
      %234 = vector.multi_reduction <add>, %233, %cst_104 [1] : vector<16x128xf32> to vector<16xf32>
      %235 = vector.shape_cast %234 : vector<16xf32> to vector<16x1xf32>
      %236 = vector.broadcast %cst : f32 to vector<16x1xf32>
      %237 = arith.mulf %235, %236 : vector<16x1xf32>
      %238 = vector.broadcast %237 : vector<16x1xf32> to vector<16x128xf32>
      %239 = arith.subf %233, %238 : vector<16x128xf32>
      %240 = arith.mulf %239, %239 : vector<16x128xf32>
      %241 = vector.broadcast %12 : vector<1x128xf32> to vector<16x128xf32>
      %242 = arith.mulf %240, %241 : vector<16x128xf32>
      %cst_105 = arith.constant dense<0.000000e+00> : vector<16xf32>
      %243 = vector.multi_reduction <add>, %242, %cst_105 [1] : vector<16x128xf32> to vector<16xf32>
      %244 = vector.shape_cast %243 : vector<16xf32> to vector<16x1xf32>
      %245 = vector.broadcast %cst : f32 to vector<16x1xf32>
      %246 = arith.mulf %244, %245 : vector<16x1xf32>
      %cst_106 = arith.constant 9.99999974E-6 : f32
      %247 = vector.broadcast %cst_106 : f32 to vector<16x1xf32>
      %248 = arith.addf %246, %247 : vector<16x1xf32>
      %249 = math.rsqrt %248 : vector<16x1xf32>
      %250 = vector.broadcast %249 : vector<16x1xf32> to vector<16x128xf32>
      %251 = arith.mulf %239, %250 : vector<16x128xf32>
      %c0_107 = arith.constant 0 : index
      %c0_108 = arith.constant 0 : index
      %252 = vector.load %arg18[%c0_107, %c0_108] : memref<16x128xf32, #tpu.memory_space<vmem>>, vector<16x128xf32>
      tpu.vector_store %arg18[%c0_107, %c0_108], %251 {strides = array<i32>} : memref<16x128xf32, #tpu.memory_space<vmem>>, vector<16x128xf32>,
    } else {
    }
    %c0 = arith.constant 0 : index
    %c0_1 = arith.constant 0 : index
    %3 = vector.load %arg18[%c0, %c0_1] : memref<16x128xf32, #tpu.memory_space<vmem>>, vector<16x128xf32>
    %c0_2 = arith.constant 0 : index
    %c0_3 = arith.constant 0 : index
    %4 = vector.load %arg15[%c0_2, %c0_3] : memref<128x128xbf16, #tpu.memory_space<vmem>>, vector<128x128xbf16>
    %c0_4 = arith.constant 0 : index
    %c0_5 = arith.constant 0 : index
    %5 = vector.load %arg16[%c0_4, %c0_5] : memref<1x128xf32, #tpu.memory_space<vmem>>, vector<1x128xf32>
    %6 = arith.truncf %3 : vector<16x128xf32> to vector<16x128xbf16>
    %cst_6 = arith.constant dense<0.000000e+00> : vector<16x128xf32>
    %7 = tpu.matmul %6, %4, %cst_6 {dimension_numbers = #tpu.dot_dimension_numbers<[1], [0], [0], [1], [0, 0, 1, 1], [], []>} : vector<16x128xbf16>, vector<128x128xbf16>, vector<16x128xf32> -> vector<16x128xf32>
    %8 = vector.broadcast %5 : vector<1x128xf32> to vector<16x128xf32>
    %9 = arith.addf %7, %8 : vector<16x128xf32>
    %c0_7 = arith.constant 0 : index
    %c0_8 = arith.constant 0 : index
    %10 = vector.load %arg17[%c0_7, %c0_8] : memref<16x128xf32, #tpu.memory_space<vmem>>, vector<16x128xf32>
    tpu.vector_store %arg17[%c0_7, %c0_8], %9 {strides = array<i32>} : memref<16x128xf32, #tpu.memory_space<vmem>>, vector<16x128xf32>,
    return
  }
  func.func @transform_0(%arg0: i32, %arg1: i32) -> (i32, i32) {
    %c0_i32 = arith.constant 0 : i32
    %c0_i32_0 = arith.constant 0 : i32
    return %arg0, %c0_i32 : i32, i32
  }
  func.func @transform_1(%arg0: i32, %arg1: i32) -> (i32, i32) {
    %c0_i32 = arith.constant 0 : i32
    %c0_i32_0 = arith.constant 0 : i32
    %c0_i32_1 = arith.constant 0 : i32
    return %c0_i32, %c0_i32_0 : i32, i32
  }
  func.func @transform_2(%arg0: i32, %arg1: i32) -> (i32, i32) {
    %c0_i32 = arith.constant 0 : i32
    %c0_i32_0 = arith.constant 0 : i32
    %c0_i32_1 = arith.constant 0 : i32
    return %c0_i32, %c0_i32_0 : i32, i32
  }
  func.func @transform_3(%arg0: i32, %arg1: i32) -> (i32, i32) {
    %c0_i32 = arith.constant 0 : i32
    %c0_i32_0 = arith.constant 0 : i32
    %c0_i32_1 = arith.constant 0 : i32
    return %c0_i32, %c0_i32_0 : i32, i32
  }
  func.func @transform_4(%arg0: i32, %arg1: i32) -> (i32, i32) {
    %c0_i32 = arith.constant 0 : i32
    %c0_i32_0 = arith.constant 0 : i32
    %c0_i32_1 = arith.constant 0 : i32
    return %c0_i32, %c0_i32_0 : i32, i32
  }
  func.func @transform_5(%arg0: i32, %arg1: i32) -> (i32, i32, i32) {
    %c0_i32 = arith.constant 0 : i32
    %c0_i32_0 = arith.constant 0 : i32
    %c0_i32_1 = arith.constant 0 : i32
    %c0_i32_2 = arith.constant 0 : i32
    return %c0_i32, %c0_i32_0, %c0_i32_1 : i32, i32, i32
  }
  func.func @transform_6(%arg0: i32, %arg1: i32) -> (i32, i32, i32) {
    %c0_i32 = arith.constant 0 : i32
    %c0_i32_0 = arith.constant 0 : i32
    %c0_i32_1 = arith.constant 0 : i32
    %c0_i32_2 = arith.constant 0 : i32
    return %c0_i32, %c0_i32_0, %c0_i32_1 : i32, i32, i32
  }
  func.func @transform_7(%arg0: i32, %arg1: i32) -> (i32, i32, i32) {
    %c0_i32 = arith.constant 0 : i32
    %c0_i32_0 = arith.constant 0 : i32
    %c0_i32_1 = arith.constant 0 : i32
    %c0_i32_2 = arith.constant 0 : i32
    return %c0_i32, %c0_i32_0, %c0_i32_1 : i32, i32, i32
  }
  func.func @transform_8(%arg0: i32, %arg1: i32) -> (i32, i32, i32) {
    %c0_i32 = arith.constant 0 : i32
    %c0_i32_0 = arith.constant 0 : i32
    %c0_i32_1 = arith.constant 0 : i32
    %c0_i32_2 = arith.constant 0 : i32
    return %c0_i32, %c0_i32_0, %c0_i32_1 : i32, i32, i32
  }
  func.func @transform_9(%arg0: i32, %arg1: i32) -> (i32, i32, i32) {
    %c0_i32 = arith.constant 0 : i32
    %c0_i32_0 = arith.constant 0 : i32
    %c0_i32_1 = arith.constant 0 : i32
    %c0_i32_2 = arith.constant 0 : i32
    return %c0_i32, %c0_i32_0, %c0_i32_1 : i32, i32, i32
  }
  func.func @transform_10(%arg0: i32, %arg1: i32) -> (i32, i32, i32) {
    %c0_i32 = arith.constant 0 : i32
    %c0_i32_0 = arith.constant 0 : i32
    %c0_i32_1 = arith.constant 0 : i32
    %c0_i32_2 = arith.constant 0 : i32
    return %c0_i32, %c0_i32_0, %c0_i32_1 : i32, i32, i32
  }
  func.func @transform_11(%arg0: i32, %arg1: i32) -> (i32, i32, i32) {
    %c0_i32 = arith.constant 0 : i32
    %c0_i32_0 = arith.constant 0 : i32
    %c0_i32_1 = arith.constant 0 : i32
    %c0_i32_2 = arith.constant 0 : i32
    return %c0_i32, %c0_i32_0, %c0_i32_1 : i32, i32, i32
  }
  func.func @transform_12(%arg0: i32, %arg1: i32) -> (i32, i32, i32) {
    %c0_i32 = arith.constant 0 : i32
    %c0_i32_0 = arith.constant 0 : i32
    %c0_i32_1 = arith.constant 0 : i32
    %c0_i32_2 = arith.constant 0 : i32
    return %c0_i32, %c0_i32_0, %c0_i32_1 : i32, i32, i32
  }
  func.func @transform_13(%arg0: i32, %arg1: i32) -> (i32, i32) {
    %c0_i32 = arith.constant 0 : i32
    %c0_i32_0 = arith.constant 0 : i32
    return %c0_i32, %arg1 : i32, i32
  }
  func.func @transform_14(%arg0: i32, %arg1: i32) -> (i32, i32) {
    %c0_i32 = arith.constant 0 : i32
    %c0_i32_0 = arith.constant 0 : i32
    return %c0_i32, %arg1 : i32, i32
  }
  func.func @transform_15(%arg0: i32, %arg1: i32) -> (i32, i32) {
    %c0_i32 = arith.constant 0 : i32
    return %arg0, %arg1 : i32, i32
  }
}

</mosaic_0001>

<bundles_post_ra>
// kernel: tpu_custom_call.1
= control target key start
LH: loop header
LB: loop body
LE: loop exit
PB: predicated region body
PF: predicated region fallthrough
CT: control target
= control target key end

     0   :  { %20 = vsyncpa [#allocation4], 0  ;;  %s3726_s0 = inlined_call_operand.vmem [shape: f32[16,128], index: 0, kind: input, shape index: {}]   ;;  %s3727_s1 = inlined_call_operand.hbm [shape: f32[1,128], index: 1, kind: input, shape index: {}]   ;;  %s3728_s2 = inlined_call_operand.vmem [shape: f32[64,128], index: 2, kind: input, shape index: {}]   ;;  %s3729_s3 = inlined_call_operand.vmem [shape: f32[64,16], index: 3, kind: input, shape index: {}]   ;;  %s3730_s4 = inlined_call_operand.hbm [shape: f32[16,64], index: 4, kind: input, shape index: {}]   ;;  %s3731_s5 = inlined_call_operand.hbm [shape: bf16[2,128,384], index: 5, kind: input, shape index: {}]   ;;  %s3732_s6 = inlined_call_operand.vmem [shape: f32[2,1,384], index: 6, kind: input, shape index: {}]   ;;  %s3733_s7 = inlined_call_operand.hbm [shape: bf16[2,128,128], index: 7, kind: input, shape index: {}]   ;;  %s3734_s8 = inlined_call_operand.vmem [shape: f32[2,1,128], index: 8, kind: input, shape index: {}]   ;;  %s3735_s9 = inlined_call_operand.hbm [shape: bf16[2,128,128], index: 9, kind: input, shape index: {}]   ;;  %s3736_s10 = inlined_call_operand.vmem [shape: f32[2,1,128], index: 10, kind: input, shape index: {}]   ;;  %s3737_s11 = inlined_call_operand.hbm [shape: bf16[2,128,128], index: 11, kind: input, shape index: {}]   ;;  %s3738_s12 = inlined_call_operand.vmem [shape: f32[2,1,128], index: 12, kind: input, shape index: {}]   ;;  %s3739_s13 = inlined_call_operand.hbm [shape: bf16[128,128], index: 13, kind: input, shape index: {}]   ;;  %s3740_s14 = inlined_call_operand.vmem [shape: f32[1,128], index: 14, kind: input, shape index: {}]   ;;  %s3741_s15 = inlined_call_operand.hbm [shape: f32[16,128], index: 15, kind: output, shape index: {}]  }
   0x1   :  { %21 = vsyncpa [#allocation7], 0 }
   0x2   :  { %22 = vsyncpa [#allocation10], 0 }
   0x3   :  { %23 = vsyncpa [#allocation13], 0 }
   0x4   :  { %24 = vsyncpa [#allocation5], 0  ;;  %s3188_s18 = smov [#allocation6]  }
   0x5   :  { %s46_s19 = sshll.u32 %s3188_s18, 4  ;;  %s47_s19 = int_to_ptr.vmem [resolvable:$true] %s46_s19 }
   0x6   :  { %s3026_s20 = scalar_lea.vmem %s47_s19, 256  ;;  %p3031_p1 = scmp.lt.s32.totalorder %s47_s19, %s47_s19 }
   0x7   :  { %p3027_p0 = scmp.ne.s32.totalorder %s47_s19, %s3026_s20  ;;  %p3032_p2 = scmp.lt.s32.totalorder %s3026_s20, %s3026_s20 }
   0x9   :  { %p3033_p3 = por %p3032_p2, %p3031_p1 }
   0xb   :  { %p3034_p4 = pnand %p3033_p3, %p3027_p0 }
   0xd   :  { %3037 = shalt.err (!%p3034_p4)
}
   0xe   :  { %s3189_s21 = smov 128   ;;  %s3190_s22 = smov 8  }
   0xf   :  { %52 = dma.hbm_to_vmem [thread:$0]  %s3730_s4, 256, %s47_s19, [#allocation7], %s3189_s21, %s3189_s21, %s3190_s22  }
  0x10   :  { %s3191_s25 = smov [#allocation9]  }
  0x11   :  { %s72_s26 = sshll.u32 %s3191_s25, 4  ;;  %s73_s26 = int_to_ptr.vmem [resolvable:$true] %s72_s26 }
  0x12   :  { %s3046_s27 = scalar_lea.vmem %s73_s26, 2048  ;;  %p3051_p6 = scmp.lt.s32.totalorder %s73_s26, %s73_s26 }
  0x13   :  { %p3047_p5 = scmp.ne.s32.totalorder %s73_s26, %s3046_s27  ;;  %p3052_p7 = scmp.lt.s32.totalorder %s3046_s27, %s3046_s27 }
  0x15   :  { %p3053_p8 = por %p3052_p7, %p3051_p6 }
  0x17   :  { %p3054_p9 = pnand %p3053_p8, %p3047_p5 }
  0x19   :  { %3057 = shalt.err (!%p3054_p9)
}
  0x1a   :  { %s3192_s28 = smov 64   ;;  %s3193_s29 = smov 4  }
  0x1b   :  { %78 = dma.hbm_to_vmem [thread:$0]  %s3733_s7, 2048, %s73_s26, [#allocation10], %s3192_s28, %s3192_s28, %s3193_s29  }
  0x1c   :  { %s3194_s4 = smov [#allocation12]   ;;  %s3195_s18 = smov [#allocation3]  }
  0x1d   :  { %s100_s17 = sshll.u32 %s3194_s4, 4  ;;  %s33_s19 = sshll.u32 %s3195_s18, 4  ;;  %s101_s17 = int_to_ptr.vmem [resolvable:$true] %s100_s17  ;;  %s34_s19 = int_to_ptr.vmem [resolvable:$true] %s33_s19 }
  0x1e   :  { %s3066_s20 = scalar_lea.vmem %s101_s17, 2048  ;;  %p3071_p11 = scmp.lt.s32.totalorder %s101_s17, %s101_s17 }
  0x1f   :  { %p3067_p10 = scmp.ne.s32.totalorder %s101_s17, %s3066_s20  ;;  %p3072_p12 = scmp.lt.s32.totalorder %s3066_s20, %s3066_s20 }
  0x21   :  { %p3073_p13 = por %p3072_p12, %p3071_p11 }
  0x23   :  { %p3074_p0 = pnand %p3073_p13, %p3067_p10 }
  0x25   :  { %3077 = shalt.err (!%p3074_p0)
}
  0x26   :  { %106 = dma.hbm_to_vmem [thread:$0]  %s3737_s11, 2048, %s101_s17, [#allocation13], %s3192_s28, %s3192_s28, %s3193_s29  }
  0x27   :  { %s3086_s7 = scalar_lea.vmem %s34_s19, 16  ;;  %s3090_s25 = scalar_lea.vmem %s34_s19, 32 }
  0x28   :  { %p3087_p1 = scmp.ne.s32.totalorder %s34_s19, %s3086_s7  ;;  %p3091_p2 = scmp.lt.s32.totalorder %s34_s19, %s34_s19 }
  0x29   :  { %p3092_p3 = scmp.lt.s32.totalorder %s3090_s25, %s3086_s7 }
  0x2b   :  { %p3093_p4 = por %p3092_p3, %p3091_p2 }
  0x2d   :  { %p3094_p5 = pnand %p3093_p4, %p3087_p1 }
  0x2f   :  { %3097 = shalt.err (!%p3094_p5)
}
  0x30   :  { %36 = dma.hbm_to_vmem [thread:$0]  %s3727_s1, 16, %s34_s19, [#allocation4]  }
  0x31   :  { %s3196_s30 = smov [#allocation8]  }
  0x32   :  { %s58_s16 = sshll.u32 %s3196_s30, 4  ;;  %s59_s16 = int_to_ptr.vmem [resolvable:$true] %s58_s16 }
  0x33   :  { %s3106_s4 = scalar_lea.vmem %s59_s16, 6144  ;;  %p3111_p7 = scmp.lt.s32.totalorder %s59_s16, %s59_s16 }
  0x34   :  { %p3107_p6 = scmp.ne.s32.totalorder %s59_s16, %s3106_s4  ;;  %p3112_p8 = scmp.lt.s32.totalorder %s3106_s4, %s3106_s4 }
  0x36   :  { %p3113_p9 = por %p3112_p8, %p3111_p7 }
  0x38   :  { %p3114_p10 = pnand %p3113_p9, %p3107_p6 }
  0x3a   :  { %3117 = shalt.err (!%p3114_p10)
}
  0x3b   :  { %s3197_s11 = smov 192   ;;  %s3198_s17 = smov 12  }
  0x3c   :  { %64 = dma.hbm_to_vmem [thread:$0]  %s3731_s5, 6144, %s59_s16, [#allocation7], %s3197_s11, %s3197_s11, %s3198_s17  }
  0x3d   :  { %s3199_s23 = smov [#allocation11]   ;;  %s3200_s1 = smov [#allocation14]  }
  0x3e   :  { %s86_s24 = sshll.u32 %s3199_s23, 4  ;;  %s114_s19 = sshll.u32 %s3200_s1, 4  ;;  %s87_s24 = int_to_ptr.vmem [resolvable:$true] %s86_s24  ;;  %s115_s19 = int_to_ptr.vmem [resolvable:$true] %s114_s19 }
  0x3f   :  { %s3126_s7 = scalar_lea.vmem %s87_s24, 2048  ;;  %p3131_p12 = scmp.lt.s32.totalorder %s87_s24, %s87_s24 }
  0x40   :  { %p3127_p11 = scmp.ne.s32.totalorder %s87_s24, %s3126_s7  ;;  %p3132_p13 = scmp.lt.s32.totalorder %s3126_s7, %s3126_s7 }
  0x42   :  { %p3133_p0 = por %p3132_p13, %p3131_p12 }
  0x44   :  { %p3134_p1 = pnand %p3133_p0, %p3127_p11 }
  0x46   :  { %3137 = shalt.err (!%p3134_p1)
}
  0x47   :  { %92 = dma.hbm_to_vmem [thread:$0]  %s3735_s9, 2048, %s87_s24, [#allocation10], %s3192_s28, %s3192_s28, %s3193_s29  }
  0x48   :  { %s3146_s5 = scalar_lea.vmem %s115_s19, 1024  ;;  %p3151_p3 = scmp.lt.s32.totalorder %s115_s19, %s115_s19 }
  0x49   :  { %p3147_p2 = scmp.ne.s32.totalorder %s115_s19, %s3146_s5  ;;  %p3152_p4 = scmp.lt.s32.totalorder %s3146_s5, %s3146_s5 }
  0x4b   :  { %p3153_p5 = por %p3152_p4, %p3151_p3 }
  0x4d   :  { %p3154_p6 = pnand %p3153_p5, %p3147_p2 }
  0x4f   :  { %3157 = shalt.err (!%p3154_p6)
}
  0x50   :  { %120 = dma.hbm_to_vmem [thread:$0]  %s3739_s13, 1024, %s115_s19, [#allocation13], %s3192_s28, %s3192_s28, %s3193_s29  }
  0x51   :  { %3178 = dma.done.wait [#allocation4], 16  }
  0x52   :  { %3179 = vsyncadd [#allocation4], 4294967280 }
  0x53   :  { %3180 = dma.done.wait [#allocation7], 6400  }
  0x54   :  { %3181 = vsyncadd [#allocation7], 4294960896 }
  0x55   :  { %3182 = dma.done.wait [#allocation10], 4096  }
  0x56   :  { %3183 = vsyncadd [#allocation10], 4294963200 }
  0x57   :  { %3184 = dma.done.wait [#allocation13], 3072  }
  0x58   :  { %3185 = vsyncadd [#allocation13], 4294964224  ;;  %v149_v0 = vld [vmem:[%s3726_s0] sm:$0xff]  ;;  %v150_v1 = vld [vmem:[%s3726_s0 + $0x8] sm:$0xff]  ;;  %v3201_v4 = vmov 0.0   ;;  %v3202_v33 = vmov 0   ;;  %v235_v50 = vlaneseq }
  0x59   :  { %170 = vadd.xlane.f32.xlu0 %v149_v0  ;;  %v2795_v2 = vld [vmem:[#allocation8 + $0xac] ss:$12 sps:$4 sm:$0xff]   ;;  %v2797_v3 = vld [vmem:[#allocation8 + $0xa8] ss:$12 sps:$4 sm:$0xff]   ;;  %2534 = vmatprep.subr.bf16.mxu1 %v3201_v4  ;;  %v2798_v5 = vld [vmem:[#allocation8 + $0xb0] ss:$12 sps:$4 sm:$0xff]  }
  0x5a   :  { %v2799_v6 = vld [vmem:[#allocation8 + $0x94] ss:$12 sps:$4 sm:$0xff]   ;;  %v2801_v7 = vld [vmem:[#allocation8 + $0x90] ss:$12 sps:$4 sm:$0xff]   ;;  %378 = vmatprep.subr.bf16.mxu0 %v2795_v2  ;;  %v2802_v8 = vld [vmem:[#allocation8 + $0x98] ss:$12 sps:$4 sm:$0xff]   ;;  %2535 = vmatpush3.bf16.msra.mxu1 %v2798_v5 }
  0x5b   :  { %379 = vmatpush1.bf16.msra.mxu0 %v2797_v3  ;;  %2536 = vmatprep.subr.bf16.mxu1 %v3201_v4  ;;  %v3332_v13 = vld [vmem:[#allocation3] ss:$0 sm:$0xff]  ;;  %v2803_v20 = vld [vmem:[#allocation8 + $0x7c] ss:$12 sps:$4 sm:$0xff]   ;;  %v2805_v21 = vld [vmem:[#allocation8 + $0x78] ss:$12 sps:$4 sm:$0xff]  }
  0x5c   :  { %380 = vmatprep.subr.bf16.mxu0 %v2799_v6  ;;  %v2806_v22 = vld [vmem:[#allocation8 + $0x80] ss:$12 sps:$4 sm:$0xff]   ;;  %v2807_v23 = vld [vmem:[#allocation8 + $0x64] ss:$12 sps:$4 sm:$0xff]   ;;  %v2810_v25 = vld [vmem:[#allocation8 + $0x68] ss:$12 sps:$4 sm:$0xff]   ;;  %410 = vmatprep.mubr.bf16.mxu0 %v3202_v33 }
  0x5d   :  { %172 = vadd.xlane.f32.xlu0 %v150_v1  ;;  %v2809_v24 = vld [vmem:[#allocation8 + $0x60] ss:$12 sps:$4 sm:$0xff]   ;;  %v2813_v27 = vld [vmem:[#allocation8 + $0x48] ss:$12 sps:$4 sm:$0xff]   ;;  %v2814_v28 = vld [vmem:[#allocation8 + $0x50] ss:$12 sps:$4 sm:$0xff]  }
  0x5e   :  { %2537 = vmatpush3.bf16.msra.mxu1 %v2802_v8  ;;  %v2811_v26 = vld [vmem:[#allocation8 + $0x4c] ss:$12 sps:$4 sm:$0xff]   ;;  %v2815_v29 = vld [vmem:[#allocation8 + $0x34] ss:$12 sps:$4 sm:$0xff]   ;;  %v2817_v30 = vld [vmem:[#allocation8 + $0x30] ss:$12 sps:$4 sm:$0xff]  }
  0x5f   :  { %381 = vmatpush1.bf16.msra.mxu0 %v2801_v7  ;;  %2538 = vmatprep.subr.bf16.mxu1 %v3201_v4  ;;  %v2818_v31 = vld [vmem:[#allocation8 + $0x38] ss:$12 sps:$4 sm:$0xff]   ;;  %v2819_v32 = vld [vmem:[#allocation8 + $0x1c] ss:$12 sps:$4 sm:$0xff]   ;;  %vm3203_vm0 = vmmov 0   ;;  %v3347_v51 = vshrl.u32 %v235_v50, 7 }
  0x60   :  { %382 = vmatprep.subr.bf16.mxu0 %v2803_v20  ;;  %2550 = vmatprep.mubr.msk.bf16.mxu1 %vm3203_vm0, %v3201_v4  ;;  %v2821_v34 = vld [vmem:[#allocation8 + $0x18] ss:$12 sps:$4 sm:$0xff]   ;;  %v2822_v35 = vld [vmem:[#allocation8 + $0x20] ss:$12 sps:$4 sm:$0xff]   ;;  %v2826_v38 = vld [vmem:[#allocation8 + $0x8] ss:$12 sps:$4 sm:$0xff]  }
  0x61   :  { %v2823_v36 = vld [vmem:[#allocation8 + $0x4] ss:$12 sps:$4 sm:$0xff]   ;;  %v2825_v37 = vld [vmem:[#allocation8] ss:$12 sps:$4 sm:$0xff]   ;;  %v237_v52 = vsub.s32 0, %v3347_v51  ;;  %v245_v54 = vsub.s32 2, %v3347_v51 }
  0x62   :  { %2539 = vmatpush3.bf16.msra.mxu1 %v2806_v22  ;;  %v232_v53 = vld [vmem:[%s3732_s6] sm:$0x7]  ;;  %v241_v55 = vsub.s32 1, %v3347_v51  ;;  %v3369_v3 = vld [vmem:[%s3728_s2 + $0x8] sm:$0xff]  ;;  %v3386_v20 = vld [vmem:[%s3728_s2 + $0x10] sm:$0xff]  ;;  %vm540_vm1 = vcmask 130048  }
  0x63   :  { %383 = vmatpush1.bf16.msra.mxu0 %v2805_v21  ;;  %2540 = vmatprep.subr.bf16.mxu1 %v3201_v4  ;;  %v238_v56 = vrot.slane %v232_v53, %v237_v52  ;;  %v246_v59 = vrot.slane %v232_v53, %v245_v54  ;;  %v3364_v2 = vld [vmem:[%s3728_s2] sm:$0xff]  ;;  %vm724_vm2 = vcmask 523264   ;;  %s3204_s28 = smov [#allocation15]  }
  0x64   :  { %384 = vmatprep.subr.bf16.mxu0 %v2807_v23  ;;  %v242_v60 = vrot.slane %v232_v53, %v241_v55  ;;  %v3393_v22 = vld [vmem:[%s3728_s2 + $0x20] sm:$0xff]  ;;  %v3448_v53 = vld [vmem:[%s3729_s3 + $0x30] sm:$0xff]  ;;  %s2282_s29 = sshll.u32 %s3204_s28, 4  ;;  %s2283_s29 = int_to_ptr.vmem [resolvable:$true] %s2282_s29 }
  0x65   :  { %s3158_s17 = scalar_lea.vmem %s2283_s29, 256  ;;  %p3163_p8 = scmp.lt.s32.totalorder %s2283_s29, %s2283_s29 }
  0x66   :  { %2541 = vmatpush3.bf16.msra.mxu1 %v2810_v25  ;;  %p3159_p7 = scmp.ne.s32.totalorder %s2283_s29, %s3158_s17  ;;  %p3164_p9 = scmp.lt.s32.totalorder %s3158_s17, %s3158_s17 }
  0x67   :  { %385 = vmatpush1.bf16.msra.mxu0 %v2809_v24  ;;  %2542 = vmatprep.subr.bf16.mxu1 %v3201_v4 }
  0x68   :  { %386 = vmatprep.subr.bf16.mxu0 %v2811_v26  ;;  %p3165_p10 = por %p3164_p9, %p3163_p8 }
  0x6a   :  { %2543 = vmatpush3.bf16.msra.mxu1 %v2814_v28  ;;  %v3402_v28 = vld [vmem:[%s3728_s2 + $0x38] sm:$0xff]  ;;  %p3166_p11 = pnand %p3165_p10, %p3159_p7 }
  0x6b   :  { %387 = vmatpush1.bf16.msra.mxu0 %v2813_v27  ;;  %2544 = vmatprep.subr.bf16.mxu1 %v3201_v4 }
  0x6c   :  { %388 = vmatprep.subr.bf16.mxu0 %v2815_v29  ;;  %v3407_v29 = vld [vmem:[%s3728_s2 + $0x30] sm:$0xff] }
  0x6e   :  { %2545 = vmatpush3.bf16.msra.mxu1 %v2818_v31 }
  0x6f   :  { %389 = vmatpush1.bf16.msra.mxu0 %v2817_v30  ;;  %2546 = vmatprep.subr.bf16.mxu1 %v3201_v4 }
  0x70   :  { %390 = vmatprep.subr.bf16.mxu0 %v2819_v32 }
  0x72   :  { %2547 = vmatpush3.bf16.msra.mxu1 %v2822_v35  ;;  %v3416_v35 = vld [vmem:[%s3729_s3] sm:$0xff] }
  0x73   :  { %391 = vmatpush1.bf16.msra.mxu0 %v2821_v34  ;;  %2548 = vmatprep.subr.bf16.mxu1 %v3201_v4 }
  0x74   :  { %392 = vmatprep.subr.bf16.mxu0 %v2823_v36  ;;  %v3421_v36 = vld [vmem:[%s3729_s3 + $0x10] sm:$0xff] }
  0x76   :  { %2549 = vmatpush3.bf16.msra.mxu1 %v2826_v38 }
  0x77   :  { %393 = vmatpush1.bf16.msra.mxu0 %v2825_v37 }
  0xe2   :  { %v171_v9 = vpop.xlane.xlu0 %170 }
  0xe3   :  { %v174_v10 = vmul.f32 0.03125, %v171_v9 }
  0xe5   :  { %v3330_v11 = vsub.f32 %v149_v0, %v174_v10 }
  0xe6   :  { %v173_v12 = vpop.xlane.xlu0 %172 }
  0xe7   :  { %v175_v14 = vmul.f32 0.03125, %v173_v12  ;;  %v178_v15 = vmul.f32 %v3330_v11, %v3330_v11 }
  0xe9   :  { %v177_v16 = vsub.f32 %v150_v1, %v175_v14  ;;  %v186_v17 = vmul.f32 %v3332_v13, %v178_v15 }
  0xeb   :  { %188 = vadd.xlane.f32.xlu1 %v186_v17  ;;  %v179_v18 = vmul.f32 %v177_v16, %v177_v16 }
  0xed   :  { %v187_v19 = vmul.f32 %v3332_v13, %v179_v18  ;;  %v3376_v18 = vld [vmem:[%s3728_s2 + $0x18] sm:$0xff] }
  0xef   :  { %190 = vadd.xlane.f32.xlu1 %v187_v19  ;;  %v3381_v19 = vld [vmem:[%s3728_s2 + $0x28] sm:$0xff] }
 0x174   :  { %v189_v39 = vpop.xlane.xlu1 %188 }
 0x175   :  { %v192_v40 = vmul.f32 0.03125, %v189_v39 }
 0x177   :  { %v194_v41 = vadd.f32 1e-05, %v192_v40  ;;  %v3427_v40 = vld [vmem:[%s3729_s3 + $0x8] sm:$0xff] }
 0x178   :  { %v191_v42 = vpop.xlane.xlu1 %190 }
 0x179   :  { %v193_v43 = vmul.f32 0.03125, %v191_v42  ;;  %2915 = vrsqrt.f32 %v194_v41 }
 0x17b   :  { %v195_v44 = vadd.f32 1e-05, %v193_v43  ;;  %v3434_v43 = vld [vmem:[%s3729_s3 + $0x18] sm:$0xff] }
 0x17d   :  { %2917 = vrsqrt.f32 %v195_v44 }
 0x186   :  { %v2916_v45 = vpop.eup %2915 }
 0x187   :  { %v198_v47 = vmul.f32 %v2916_v45, %v3330_v11 }
 0x18a   :  { %v2918_v46 = vpop.eup %2917 }
 0x18b   :  { %v199_v48 = vmul.f32 %v2918_v46, %v177_v16 }
 0x18d   :  { %v233_v49 = vpack.c.bf16 %v199_v48, %v198_v47  ;;  %v3440_v47 = vld [vmem:[%s3729_s3 + $0x20] sm:$0xff] }
 0x18f   :  { %411 = vmatmul.mubr.bf16.vlgmr.msra.gmra.mxu0 %v233_v49  ;;  %2551 = vmatmul.mubr.bf16.vlgmr.msra.gmra.mxu1 %v233_v49 }
 0x24f   :  { %v412_v57 = vpop.f32.mrf.mxu0  ;;  %v455_v58 = vpop.f32.mrf.mxu1 }
 0x250   :  { %v413_v63 = vadd.f32 %v412_v57, %v238_v56  ;;  %v456_v5 = vadd.f32 %v455_v58, %v246_v59 }
 0x251   :  { %v414_v61 = vpop.f32.mrf.mxu0  ;;  %v2552_v62 = vpop.f32.mrf.mxu1 }
 0x252   :  { %v415_v8 = vadd.f32 %v414_v61, %v242_v60  ;;  %v462_v14 = vmul.f32 %v413_v63, %v3364_v2  ;;  %v464_v24 = vmul.f32 %v413_v63, %v3386_v20  ;;  %v466_v25 = vmul.f32 %v413_v63, %v3393_v22 }
 0x253   :  { %v416_v0 = vpop.f32.mrf.mxu0  ;;  %v458_v1 = vpop.f32.mrf.mxu1  ;;  %v468_v31 = vmul.f32 %v413_v63, %v3407_v29  ;;  %v3462_v63 = vld [vmem:[%s3729_s3 + $0x38] sm:$0xff] }
 0x254   :  { %v417_v6 = vadd.f32 %v416_v0, %v238_v56  ;;  %v459_v7 = vadd.f32 %v458_v1, %v246_v59  ;;  %v3454_v59 = vld [vmem:[%s3729_s3 + $0x28] sm:$0xff] }
 0x255   :  { %v418_v9 = vpop.f32.mrf.mxu0  ;;  %v2553_v10 = vpop.f32.mrf.mxu1 }
 0x256   :  { %v633_v11 = vpack.c.bf16 %v459_v7, %v456_v5  ;;  %v419_v12 = vadd.f32 %v418_v9, %v242_v60  ;;  %v463_v15 = vmul.f32 %v417_v6, %v3369_v3  ;;  %v465_v21 = vmul.f32 %v417_v6, %v3376_v18 }
 0x257   :  { %v467_v23 = vmul.f32 %v417_v6, %v3381_v19  ;;  %v469_v30 = vmul.f32 %v417_v6, %v3402_v28 }
 0x258   :  { %v474_v16 = vpack.c.bf16 %v419_v12, %v415_v8  ;;  %2564 = vmatprep.subr.bf16.mxu1 %v633_v11  ;;  %v470_v17 = vpack.c.bf16 %v463_v15, %v462_v14  ;;  %v471_v26 = vpack.c.bf16 %v465_v21, %v464_v24 }
 0x259   :  { %2565 = vmatpush3.bf16.msra.mxu1 %v633_v11  ;;  %v472_v27 = vpack.c.bf16 %v467_v23, %v466_v25  ;;  %v473_v32 = vpack.c.bf16 %v469_v30, %v468_v31 }
 0x25a   :  { %2554 = vmatprep.subr.bf16.mxu0 %v474_v16  ;;  %2556 = vmatprep.mubr.bf16.mxu0 %v470_v17 }
 0x25b   :  { %2555 = vmatpush3.bf16.xpose.msra.mxu0 %v474_v16  ;;  %2586 = vmatprep.subr.bf16.mxu1 %v3201_v4 }
 0x25c   :  { %2574 = vmatprep.subr.bf16.mxu0 %v3201_v4 }
 0x262   :  { %2557 = vmatmul.mubr.bf16.vlgmr.msra.gmra.mxu0 %v471_v26 }
 0x263   :  { %2560 = vmatprep.mubr.bf16.mxu0 %v472_v27 }
 0x26a   :  { %2561 = vmatmul.mubr.bf16.gmra.mxu0 %v473_v32 }
 0x26b   :  { %2582 = vmatprep.mubr.msk.bf16.mxu0 %vm3203_vm0, %v3201_v4 }
 0x322   :  { %v2558_v34 = vpop.f32.mrf.mxu0 }
 0x323   :  { %v518_v41 = vadd.f32 %v2558_v34, %v3421_v36 }
 0x324   :  { %v509_v37 = vpop.f32.mrf.mxu0 }
 0x325   :  { %v510_v38 = vadd.f32 %v509_v37, %v3416_v35  ;;  %v547_v50 = vsel %vm540_vm1, %v518_v41, -inf }
 0x326   :  { %v2559_v39 = vpop.f32.mrf.mxu0 }
 0x327   :  { %v541_v42 = vsel %vm540_vm1, %v510_v38, -inf  ;;  %v521_v48 = vadd.f32 %v2559_v39, %v3434_v43 }
 0x328   :  { %v512_v44 = vpop.f32.mrf.mxu0  ;;  %542 = vmax.xlane.f32.xlu0 %v541_v42 }
 0x329   :  { %v513_v45 = vadd.f32 %v512_v44, %v3427_v40  ;;  %v550_v61 = vsel %vm540_vm1, %v521_v48, -inf }
 0x32a   :  { %v2562_v46 = vpop.f32.mrf.mxu0 }
 0x32b   :  { %v544_v49 = vsel %vm540_vm1, %v513_v45, -inf  ;;  %v534_v60 = vadd.f32 %v2562_v46, %v3448_v53 }
 0x32c   :  { %v525_v56 = vpop.f32.mrf.mxu0  ;;  %545 = vmax.xlane.f32.xlu1 %v544_v49  ;;  %548 = vmax.xlane.f32.xlu0 %v547_v50 }
 0x32d   :  { %v526_v57 = vadd.f32 %v525_v56, %v3440_v47  ;;  %v559_v7 = vsel %vm540_vm1, %v534_v60, -inf }
 0x32e   :  { %v2563_v58 = vpop.f32.mrf.mxu0 }
 0x32f   :  { %v553_v62 = vsel %vm540_vm1, %v526_v57, -inf  ;;  %v537_v5 = vadd.f32 %v2563_v58, %v3462_v63 }
 0x330   :  { %v528_v0 = vpop.f32.mrf.mxu0  ;;  %551 = vmax.xlane.f32.xlu1 %v550_v61  ;;  %554 = vmax.xlane.f32.xlu0 %v553_v62 }
 0x331   :  { %v529_v1 = vadd.f32 %v528_v0, %v3454_v59  ;;  %v562_v8 = vsel %vm540_vm1, %v537_v5, -inf }
 0x333   :  { %v556_v6 = vsel %vm540_vm1, %v529_v1, -inf }
 0x334   :  { %557 = vmax.xlane.f32.xlu1 %v556_v6  ;;  %560 = vmax.xlane.f32.xlu0 %v559_v7 }
 0x338   :  { %563 = vmax.xlane.f32.xlu1 %v562_v8 }
 0x3b1   :  { %v543_v9 = vpop.xlane.xlu0 %542 }
 0x3b2   :  { %v565_v10 = vsub.f32 %v510_v38, %v543_v9 }
 0x3b4   :  { %v573_v11 = vmul.f32 1.442695, %v565_v10 }
 0x3b5   :  { %v546_v12 = vpop.xlane.xlu1 %545  ;;  %v549_v14 = vpop.xlane.xlu0 %548 }
 0x3b6   :  { %2919 = vpow2.f32 %v573_v11  ;;  %v566_v15 = vsub.f32 %v513_v45, %v546_v12  ;;  %v567_v16 = vsub.f32 %v518_v41, %v549_v14 }
 0x3b8   :  { %v575_v17 = vmul.f32 1.442695, %v566_v15  ;;  %v577_v21 = vmul.f32 1.442695, %v567_v16 }
 0x3b9   :  { %v552_v23 = vpop.xlane.xlu1 %551  ;;  %v555_v24 = vpop.xlane.xlu0 %554 }
 0x3ba   :  { %2921 = vpow2.f32 %v575_v17  ;;  %v568_v25 = vsub.f32 %v521_v48, %v552_v23  ;;  %v569_v26 = vsub.f32 %v526_v57, %v555_v24 }
 0x3bb   :  { %2923 = vpow2.f32 %v577_v21 }
 0x3bc   :  { %v579_v27 = vmul.f32 1.442695, %v568_v25  ;;  %v581_v30 = vmul.f32 1.442695, %v569_v26 }
 0x3bd   :  { %v558_v31 = vpop.xlane.xlu1 %557  ;;  %v561_v32 = vpop.xlane.xlu0 %560 }
 0x3be   :  { %2925 = vpow2.f32 %v579_v27  ;;  %v570_v34 = vsub.f32 %v529_v1, %v558_v31  ;;  %v571_v37 = vsub.f32 %v534_v60, %v561_v32 }
 0x3bf   :  { %2927 = vpow2.f32 %v581_v30 }
 0x3c0   :  { %v583_v38 = vmul.f32 1.442695, %v570_v34  ;;  %v585_v39 = vmul.f32 1.442695, %v571_v37 }
 0x3c1   :  { %v564_v42 = vpop.xlane.xlu1 %563 }
 0x3c2   :  { %2929 = vpow2.f32 %v583_v38  ;;  %v572_v41 = vsub.f32 %v537_v5, %v564_v42 }
 0x3c3   :  { %v2920_v44 = vpop.eup %2919  ;;  %2931 = vpow2.f32 %v585_v39 }
 0x3c4   :  { %v587_v45 = vmul.f32 1.442695, %v572_v41  ;;  %v589_v46 = vsel %vm540_vm1, %v2920_v44, 0.0 }
 0x3c5   :  { %590 = vadd.xlane.f32.xlu0 %v589_v46 }
 0x3c6   :  { %2933 = vpow2.f32 %v587_v45 }
 0x3c7   :  { %v2922_v48 = vpop.eup %2921 }
 0x3c8   :  { %v2924_v49 = vpop.eup %2923  ;;  %v592_v50 = vsel %vm540_vm1, %v2922_v48, 0.0 }
 0x3c9   :  { %593 = vadd.xlane.f32.xlu1 %v592_v50  ;;  %v595_v56 = vsel %vm540_vm1, %v2924_v49, 0.0  ;;  %v2828_v50 = vld [vmem:[#allocation9 + $0x30] sm:$0xff]  }
 0x3ca   :  { %596 = vadd.xlane.f32.xlu0 %v595_v56  ;;  %v2829_v56 = vld [vmem:[#allocation9 + $0x28] sm:$0xff]  }
 0x3cb   :  { %v2926_v57 = vpop.eup %2925 }
 0x3cc   :  { %v2928_v58 = vpop.eup %2927  ;;  %v598_v60 = vsel %vm540_vm1, %v2926_v57, 0.0 }
 0x3cd   :  { %599 = vadd.xlane.f32.xlu1 %v598_v60  ;;  %v601_v61 = vsel %vm540_vm1, %v2928_v58, 0.0  ;;  %v2832_v60 = vld [vmem:[#allocation9 + $0x10] sm:$0xff]  }
 0x3ce   :  { %602 = vadd.xlane.f32.xlu0 %v601_v61 }
 0x3cf   :  { %v2930_v62 = vpop.eup %2929 }
 0x3d0   :  { %v2932_v0 = vpop.eup %2931  ;;  %v604_v1 = vsel %vm540_vm1, %v2930_v62, 0.0 }
 0x3d1   :  { %605 = vadd.xlane.f32.xlu1 %v604_v1  ;;  %v607_v5 = vsel %vm540_vm1, %v2932_v0, 0.0 }
 0x3d2   :  { %608 = vadd.xlane.f32.xlu0 %v607_v5 }
 0x3d3   :  { %v2934_v6 = vpop.eup %2933 }
 0x3d4   :  { %v610_v7 = vsel %vm540_vm1, %v2934_v6, 0.0 }
 0x3d5   :  { %611 = vadd.xlane.f32.xlu1 %v610_v7 }
 0x44e   :  { %v591_v8 = vpop.xlane.xlu0 %590 }
 0x44f   :  { %2935 = vrcp.f32 %v591_v8 }
 0x452   :  { %v594_v9 = vpop.xlane.xlu1 %593 }
 0x453   :  { %2937 = vrcp.f32 %v594_v9  ;;  %v597_v10 = vpop.xlane.xlu0 %596 }
 0x454   :  { %2939 = vrcp.f32 %v597_v10 }
 0x456   :  { %v600_v11 = vpop.xlane.xlu1 %599 }
 0x457   :  { %2941 = vrcp.f32 %v600_v11  ;;  %v603_v12 = vpop.xlane.xlu0 %602 }
 0x458   :  { %2943 = vrcp.f32 %v603_v12 }
 0x45a   :  { %v606_v14 = vpop.xlane.xlu1 %605 }
 0x45b   :  { %2945 = vrcp.f32 %v606_v14  ;;  %v609_v15 = vpop.xlane.xlu0 %608 }
 0x45c   :  { %2947 = vrcp.f32 %v609_v15  ;;  %v2936_v16 = vpop.eup %2935 }
 0x45d   :  { %v621_v23 = vmul.f32 %v2936_v16, %v2920_v44 }
 0x45e   :  { %v612_v17 = vpop.xlane.xlu1 %611 }
 0x45f   :  { %2949 = vrcp.f32 %v612_v17 }
 0x460   :  { %v2938_v21 = vpop.eup %2937 }
 0x461   :  { %v622_v24 = vmul.f32 %v2938_v21, %v2922_v48  ;;  %v2940_v25 = vpop.eup %2939 }
 0x462   :  { %v623_v30 = vmul.f32 %v2940_v25, %v2924_v49  ;;  %v2827_v49 = vld [vmem:[#allocation9 + $0x38] sm:$0xff]   ;;  %v168_v25 = vld [vmem:[#allocation6] sm:$0xff] }
 0x463   :  { %v629_v26 = vpack.c.bf16 %v622_v24, %v621_v23 }
 0x464   :  { %v2942_v27 = vpop.eup %2941 }
 0x465   :  { %2566 = vmatprep.mubr.msk.bf16.mxu1 %vm540_vm1, %v629_v26  ;;  %v624_v31 = vmul.f32 %v2942_v27, %v2926_v57  ;;  %v2944_v32 = vpop.eup %2943  ;;  %v2830_v57 = vld [vmem:[#allocation9 + $0x20] sm:$0xff]   ;;  %v169_v26 = vld [vmem:[#allocation6 + $0x8] sm:$0xff] }
 0x466   :  { %v625_v38 = vmul.f32 %v2944_v32, %v2928_v58  ;;  %v2831_v58 = vld [vmem:[#allocation9 + $0x18] sm:$0xff]   ;;  %v2834_v32 = vld [vmem:[#allocation9] sm:$0xff]  }
 0x467   :  { %v630_v34 = vpack.c.bf16 %v624_v31, %v623_v30  ;;  %v3500_v30 = vpack.c.bf16 %v169_v26, %v168_v25  ;;  %v2833_v31 = vld [vmem:[#allocation9 + $0x8] sm:$0xff]  }
 0x468   :  { %v2946_v37 = vpop.eup %2945 }
 0x469   :  { %2567 = vmatmul.mubr.msk.bf16.vlgmr.msra.gmra.mxu1 %vm540_vm1, %v630_v34  ;;  %v626_v39 = vmul.f32 %v2946_v37, %v2930_v62  ;;  %v2948_v42 = vpop.eup %2947 }
 0x46a   :  { %v627_v44 = vmul.f32 %v2948_v42, %v2932_v0  ;;  %2587 = vmatpush3.bf16.msra.mxu1 %v2827_v49 }
 0x46b   :  { %v631_v41 = vpack.c.bf16 %v626_v39, %v625_v38  ;;  %2588 = vmatprep.subr.bf16.mxu1 %v3201_v4 }
 0x46c   :  { %v2950_v45 = vpop.eup %2949 }
 0x46d   :  { %2570 = vmatprep.mubr.msk.bf16.mxu1 %vm540_vm1, %v631_v41  ;;  %v628_v46 = vmul.f32 %v2950_v45, %v2934_v6  ;;  %v2327_v41 = vld [vmem:[%s3734_s8] ss:$0 sm:$0xff] }
 0x46e   :  { %2589 = vmatpush3.bf16.msra.mxu1 %v2828_v50 }
 0x46f   :  { %v632_v48 = vpack.c.bf16 %v628_v46, %v627_v44  ;;  %2590 = vmatprep.subr.bf16.mxu1 %v3201_v4 }
 0x471   :  { %2571 = vmatmul.mubr.msk.bf16.gmra.mxu1 %vm540_vm1, %v632_v48  ;;  %v3007_v48 = vld [vmem:[%s3726_s0] sm:$0xff] }
 0x472   :  { %2602 = vmatprep.mubr.msk.bf16.mxu1 %vm3203_vm0, %v3201_v4  ;;  %2591 = vmatpush3.bf16.msra.mxu1 %v2829_v56 }
 0x473   :  { %2592 = vmatprep.subr.bf16.mxu1 %v3201_v4 }
 0x476   :  { %2593 = vmatpush3.bf16.msra.mxu1 %v2830_v57 }
 0x477   :  { %2594 = vmatprep.subr.bf16.mxu1 %v3201_v4 }
 0x47a   :  { %2595 = vmatpush3.bf16.msra.mxu1 %v2831_v58  ;;  %v3008_v58 = vld [vmem:[%s3726_s0 + $0x8] sm:$0xff] }
 0x47b   :  { %2596 = vmatprep.subr.bf16.mxu1 %v3201_v4 }
 0x47e   :  { %2597 = vmatpush3.bf16.msra.mxu1 %v2832_v60 }
 0x47f   :  { %2598 = vmatprep.subr.bf16.mxu1 %v3201_v4 }
 0x482   :  { %2599 = vmatpush3.bf16.msra.mxu1 %v2833_v31 }
 0x483   :  { %2600 = vmatprep.subr.bf16.mxu1 %v3201_v4 }
 0x486   :  { %2601 = vmatpush3.bf16.msra.mxu1 %v2834_v32 }
 0x487   :  { %2626 = vmatprep.subr.bf16.mxu1 %v3201_v4 }
 0x529   :  { %v2568_v61 = vpop.f32.mrf.mxu1 }
 0x52a   :  { %v713_v17 = vmul.f32 %v2568_v61, %v3386_v20  ;;  %v2835_v61 = vld [vmem:[#allocation11 + $0x38] sm:$0xff]  }
 0x52b   :  { %v680_v62 = vpop.f32.mrf.mxu1 }
 0x52c   :  { %v711_v24 = vmul.f32 %v680_v62, %v3364_v2  ;;  %v2836_v62 = vld [vmem:[#allocation11 + $0x30] sm:$0xff]  }
 0x52d   :  { %v2569_v0 = vpop.f32.mrf.mxu1 }
 0x52e   :  { %v714_v15 = vmul.f32 %v2569_v0, %v3376_v18 }
 0x52f   :  { %v683_v1 = vpop.f32.mrf.mxu1 }
 0x530   :  { %v721_v21 = vpack.c.bf16 %v714_v15, %v713_v17  ;;  %v712_v23 = vmul.f32 %v683_v1, %v3369_v3  ;;  %v2838_v15 = vld [vmem:[#allocation11 + $0x20] sm:$0xff]   ;;  %v2840_v17 = vld [vmem:[#allocation11 + $0x10] sm:$0xff]  }
 0x531   :  { %v2572_v5 = vpop.f32.mrf.mxu1 }
 0x532   :  { %v717_v8 = vmul.f32 %v2572_v5, %v3407_v29  ;;  %v720_v27 = vpack.c.bf16 %v712_v23, %v711_v24  ;;  %v2842_v23 = vld [vmem:[#allocation11] sm:$0xff]  }
 0x533   :  { %v696_v6 = vpop.f32.mrf.mxu1 }
 0x534   :  { %v715_v14 = vmul.f32 %v696_v6, %v3393_v22 }
 0x535   :  { %v2573_v7 = vpop.f32.mrf.mxu1 }
 0x536   :  { %v718_v9 = vmul.f32 %v2573_v7, %v3402_v28 }
 0x537   :  { %v699_v10 = vpop.f32.mrf.mxu1 }
 0x538   :  { %v723_v11 = vpack.c.bf16 %v718_v9, %v717_v8  ;;  %v716_v12 = vmul.f32 %v699_v10, %v3381_v19 }
 0x53a   :  { %2575 = vmatpush3.bf16.msra.mxu0 %v723_v11  ;;  %v722_v16 = vpack.c.bf16 %v716_v12, %v715_v14  ;;  %v2837_v14 = vld [vmem:[#allocation11 + $0x28] sm:$0xff]  }
 0x53b   :  { %2576 = vmatprep.subr.bf16.mxu0 %v3201_v4 }
 0x53e   :  { %2577 = vmatpush3.bf16.msra.mxu0 %v722_v16  ;;  %v2839_v16 = vld [vmem:[#allocation11 + $0x18] sm:$0xff]  }
 0x53f   :  { %2578 = vmatprep.subr.bf16.mxu0 %v3201_v4 }
 0x542   :  { %2579 = vmatpush3.bf16.msra.mxu0 %v721_v21  ;;  %v2841_v21 = vld [vmem:[#allocation11 + $0x8] sm:$0xff]  }
 0x543   :  { %2580 = vmatprep.subr.bf16.mxu0 %v3201_v4 }
 0x546   :  { %2581 = vmatpush3.bf16.msra.mxu0 %v720_v27 }
 0x547   :  { %2606 = vmatprep.subr.bf16.mxu0 %v3201_v4 }
 0x549   :  { %2583 = vmatmul.mubr.msk.bf16.vlgmr.msra.gmra.mxu0 %vm724_vm2, %v3500_v30 }
 0x54a   :  { %2622 = vmatprep.mubr.msk.bf16.mxu0 %vm3203_vm0, %v3201_v4  ;;  %2607 = vmatpush3.bf16.msra.mxu0 %v2835_v61 }
 0x54b   :  { %2608 = vmatprep.subr.bf16.mxu0 %v3201_v4 }
 0x54e   :  { %2609 = vmatpush3.bf16.msra.mxu0 %v2836_v62 }
 0x54f   :  { %2610 = vmatprep.subr.bf16.mxu0 %v3201_v4 }
 0x552   :  { %2611 = vmatpush3.bf16.msra.mxu0 %v2837_v14 }
 0x553   :  { %2612 = vmatprep.subr.bf16.mxu0 %v3201_v4 }
 0x556   :  { %2613 = vmatpush3.bf16.msra.mxu0 %v2838_v15 }
 0x557   :  { %2614 = vmatprep.subr.bf16.mxu0 %v3201_v4 }
 0x55a   :  { %2615 = vmatpush3.bf16.msra.mxu0 %v2839_v16 }
 0x55b   :  { %2616 = vmatprep.subr.bf16.mxu0 %v3201_v4 }
 0x55e   :  { %2617 = vmatpush3.bf16.msra.mxu0 %v2840_v17 }
 0x55f   :  { %2618 = vmatprep.subr.bf16.mxu0 %v3201_v4 }
 0x562   :  { %2619 = vmatpush3.bf16.msra.mxu0 %v2841_v21 }
 0x563   :  { %2620 = vmatprep.subr.bf16.mxu0 %v3201_v4 }
 0x566   :  { %2621 = vmatpush3.bf16.msra.mxu0 %v2842_v23 }
 0x609   :  { %v762_v34 = vpop.f32.mrf.mxu0 }
 0x60b   :  { %v2584_v37 = vpop.f32.mrf.mxu0 }
 0x60d   :  { %v765_v38 = vpop.f32.mrf.mxu0 }
 0x60e   :  { %v786_v39 = vpack.c.bf16 %v765_v38, %v762_v34 }
 0x60f   :  { %v2585_v42 = vpop.f32.mrf.mxu0 }
 0x610   :  { %2603 = vmatmul.mubr.bf16.vlgmr.msra.gmra.mxu1 %v786_v39 }
 0x611   :  { %2642 = vmatprep.mubr.msk.bf16.mxu1 %vm3203_vm0, %v3201_v4 }
 0x6d0   :  { %v875_v45 = vpop.f32.mrf.mxu1 }
 0x6d1   :  { %v876_v44 = vadd.f32 %v2327_v41, %v875_v45  ;;  %v2844_v45 = vld [vmem:[#allocation12 + $0x30] sm:$0xff]  }
 0x6d2   :  { %v2604_v46 = vpop.f32.mrf.mxu1 }
 0x6d3   :  { %v3517_v49 = vadd.f32 %v3007_v48, %v876_v44  ;;  %v2845_v44 = vld [vmem:[#allocation12 + $0x28] sm:$0xff]   ;;  %v2846_v46 = vld [vmem:[#allocation12 + $0x20] sm:$0xff]   ;;  %v2847_v48 = vld [vmem:[#allocation12 + $0x18] sm:$0xff]  }
 0x6d4   :  { %v878_v50 = vpop.f32.mrf.mxu1 }
 0x6d5   :  { %v879_v56 = vadd.f32 %v2327_v41, %v878_v50  ;;  %884 = vadd.xlane.f32.xlu0 %v3517_v49  ;;  %v2843_v41 = vld [vmem:[#allocation12 + $0x38] sm:$0xff]   ;;  %v2848_v50 = vld [vmem:[#allocation12 + $0x10] sm:$0xff]  }
 0x6d6   :  { %v2605_v57 = vpop.f32.mrf.mxu1  ;;  %2627 = vmatpush3.bf16.msra.mxu1 %v2843_v41 }
 0x6d7   :  { %v3523_v60 = vadd.f32 %v3008_v58, %v879_v56  ;;  %2628 = vmatprep.subr.bf16.mxu1 %v3201_v4  ;;  %v2850_v56 = vld [vmem:[#allocation12] sm:$0xff]   ;;  %v2336_v57 = vld [vmem:[%s3736_s10] ss:$0 sm:$0xff] }
 0x6d9   :  { %886 = vadd.xlane.f32.xlu1 %v3523_v60 }
 0x6da   :  { %2629 = vmatpush3.bf16.msra.mxu1 %v2844_v45 }
 0x6db   :  { %2630 = vmatprep.subr.bf16.mxu1 %v3201_v4 }
 0x6de   :  { %2631 = vmatpush3.bf16.msra.mxu1 %v2845_v44 }
 0x6df   :  { %2632 = vmatprep.subr.bf16.mxu1 %v3201_v4 }
 0x6e2   :  { %2633 = vmatpush3.bf16.msra.mxu1 %v2846_v46 }
 0x6e3   :  { %2634 = vmatprep.subr.bf16.mxu1 %v3201_v4 }
 0x6e6   :  { %2635 = vmatpush3.bf16.msra.mxu1 %v2847_v48  ;;  %v2851_v48 = vld [vmem:[#allocation8 + $0x168] ss:$12 sps:$4 sm:$0xff]  }
 0x6e7   :  { %2636 = vmatprep.subr.bf16.mxu1 %v3201_v4 }
 0x6ea   :  { %2637 = vmatpush3.bf16.msra.mxu1 %v2848_v50  ;;  %v2853_v50 = vld [vmem:[#allocation8 + $0x16c] ss:$12 sps:$4 sm:$0xff]  }
 0x6eb   :  { %2638 = vmatprep.subr.bf16.mxu1 %v3201_v4  ;;  %1358 = vmatprep.subr.bf16.mxu0 %v2853_v50 }
 0x75e   :  { %v885_v0 = vpop.xlane.xlu0 %884 }
 0x75f   :  { %v888_v1 = vmul.f32 0.03125, %v885_v0 }
 0x761   :  { %v890_v5 = vsub.f32 %v3517_v49, %v888_v1 }
 0x762   :  { %v887_v6 = vpop.xlane.xlu1 %886 }
 0x763   :  { %v889_v7 = vmul.f32 0.03125, %v887_v6  ;;  %v892_v8 = vmul.f32 %v890_v5, %v890_v5 }
 0x765   :  { %v891_v9 = vsub.f32 %v3523_v60, %v889_v7  ;;  %v894_v10 = vmul.f32 %v3332_v13, %v892_v8 }
 0x767   :  { %896 = vadd.xlane.f32.xlu0 %v894_v10  ;;  %v893_v11 = vmul.f32 %v891_v9, %v891_v9 }
 0x769   :  { %v895_v12 = vmul.f32 %v3332_v13, %v893_v11 }
 0x76b   :  { %898 = vadd.xlane.f32.xlu1 %v895_v12 }
 0x7f0   :  { %v897_v24 = vpop.xlane.xlu0 %896 }
 0x7f1   :  { %v900_v25 = vmul.f32 0.03125, %v897_v24 }
 0x7f3   :  { %v902_v26 = vadd.f32 1e-05, %v900_v25 }
 0x7f4   :  { %v899_v27 = vpop.xlane.xlu1 %898 }
 0x7f5   :  { %v901_v31 = vmul.f32 0.03125, %v899_v27  ;;  %2951 = vrsqrt.f32 %v902_v26 }
 0x7f7   :  { %v903_v32 = vadd.f32 1e-05, %v901_v31 }
 0x7f9   :  { %2953 = vrsqrt.f32 %v903_v32 }
 0x802   :  { %v2952_v34 = vpop.eup %2951 }
 0x803   :  { %v906_v38 = vmul.f32 %v2952_v34, %v890_v5  ;;  %v2345_v34 = vld [vmem:[%s3738_s12] ss:$0 sm:$0xff] }
 0x806   :  { %v2954_v37 = vpop.eup %2953 }
 0x807   :  { %v907_v39 = vmul.f32 %v2954_v37, %v891_v9 }
 0x809   :  { %v925_v42 = vpack.c.bf16 %v907_v39, %v906_v38 }
 0x80b   :  { %2623 = vmatmul.mubr.bf16.vlgmr.msra.gmra.mxu0 %v925_v42 }
 0x80c   :  { %1390 = vmatprep.mubr.bf16.mxu0 %v3202_v33  ;;  %v2849_v33 = vld [vmem:[#allocation12 + $0x8] sm:$0xff]   ;;  %1359 = vmatpush1.bf16.msra.mxu0 %v2851_v48 }
 0x80d   :  { %2639 = vmatpush3.bf16.msra.mxu1 %v2849_v33  ;;  %v2854_v33 = vld [vmem:[#allocation8 + $0x170] ss:$12 sps:$4 sm:$0xff]  }
 0x80e   :  { %2640 = vmatprep.subr.bf16.mxu1 %v3201_v4 }
 0x811   :  { %2641 = vmatpush3.bf16.msra.mxu1 %v2850_v56  ;;  %v2857_v56 = vld [vmem:[#allocation8 + $0x154] ss:$12 sps:$4 sm:$0xff]  }
 0x812   :  { %2646 = vmatprep.subr.bf16.mxu1 %v3201_v4  ;;  %1360 = vmatprep.subr.bf16.mxu0 %v2857_v56 }
 0x8cb   :  { %v1014_v58 = vpop.f32.mrf.mxu0 }
 0x8cc   :  { %v1015_v61 = vadd.f32 %v2336_v57, %v1014_v58 }
 0x8cd   :  { %v2624_v62 = vpop.f32.mrf.mxu0 }
 0x8ce   :  { %v1023_v0 = vmul.f32 0.044715, %v1015_v61  ;;  %v1021_v24 = vmul.f32 0.5, %v1015_v61 }
 0x8cf   :  { %v1017_v1 = vpop.f32.mrf.mxu0 }
 0x8d0   :  { %v1025_v5 = vmul.f32 %v1023_v0, %v1015_v61  ;;  %v1018_v6 = vadd.f32 %v2336_v57, %v1017_v1  ;;  %v2858_v57 = vld [vmem:[#allocation8 + $0x158] ss:$12 sps:$4 sm:$0xff]  }
 0x8d1   :  { %v2625_v7 = vpop.f32.mrf.mxu0 }
 0x8d2   :  { %v1027_v8 = vmul.f32 %v1025_v5, %v1015_v61  ;;  %v1024_v9 = vmul.f32 0.044715, %v1018_v6  ;;  %v1022_v25 = vmul.f32 0.5, %v1018_v6 }
 0x8d4   :  { %v1029_v10 = vadd.f32 %v1027_v8, %v1015_v61  ;;  %v1026_v11 = vmul.f32 %v1024_v9, %v1018_v6  ;;  %v2861_v9 = vld [vmem:[#allocation8 + $0x13c] ss:$12 sps:$4 sm:$0xff]  }
 0x8d6   :  { %v1031_v12 = vmul.f32 0.7978846, %v1029_v10  ;;  %v1028_v14 = vmul.f32 %v1026_v11, %v1018_v6  ;;  %v2859_v10 = vld [vmem:[#allocation8 + $0x138] ss:$12 sps:$4 sm:$0xff]   ;;  %v2862_v11 = vld [vmem:[#allocation8 + $0x140] ss:$12 sps:$4 sm:$0xff]  }
 0x8d8   :  { %2955 = vtanh.f32 %v1031_v12  ;;  %v1030_v15 = vadd.f32 %v1028_v14, %v1018_v6  ;;  %v2865_v12 = vld [vmem:[#allocation8 + $0x124] ss:$12 sps:$4 sm:$0xff]   ;;  %v2863_v14 = vld [vmem:[#allocation8 + $0x120] ss:$12 sps:$4 sm:$0xff]  }
 0x8da   :  { %v1032_v16 = vmul.f32 0.7978846, %v1030_v15  ;;  %v2866_v15 = vld [vmem:[#allocation8 + $0x128] ss:$12 sps:$4 sm:$0xff]  }
 0x8dc   :  { %2957 = vtanh.f32 %v1032_v16  ;;  %v2867_v16 = vld [vmem:[#allocation8 + $0x108] ss:$12 sps:$4 sm:$0xff]  }
 0x8e5   :  { %v2956_v17 = vpop.eup %2955 }
 0x8e6   :  { %v1035_v21 = vadd.f32 1.0, %v2956_v17  ;;  %v2869_v17 = vld [vmem:[#allocation8 + $0x10c] ss:$12 sps:$4 sm:$0xff]  }
 0x8e8   :  { %v1037_v27 = vmul.f32 %v1035_v21, %v1021_v24  ;;  %v2870_v21 = vld [vmem:[#allocation8 + $0x110] ss:$12 sps:$4 sm:$0xff]   ;;  %v2874_v24 = vld [vmem:[#allocation8 + $0xf8] ss:$12 sps:$4 sm:$0xff]  }
 0x8e9   :  { %v2958_v23 = vpop.eup %2957 }
 0x8ea   :  { %v1036_v26 = vadd.f32 1.0, %v2958_v23  ;;  %v2871_v23 = vld [vmem:[#allocation8 + $0xf0] ss:$12 sps:$4 sm:$0xff]  }
 0x8ec   :  { %v1038_v31 = vmul.f32 %v1036_v26, %v1022_v25  ;;  %v2877_v25 = vld [vmem:[#allocation8 + $0xdc] ss:$12 sps:$4 sm:$0xff]   ;;  %v2875_v26 = vld [vmem:[#allocation8 + $0xd8] ss:$12 sps:$4 sm:$0xff]  }
 0x8ee   :  { %v1056_v32 = vpack.c.bf16 %v1038_v31, %v1037_v27  ;;  %v2878_v27 = vld [vmem:[#allocation8 + $0xe0] ss:$12 sps:$4 sm:$0xff]   ;;  %v2881_v31 = vld [vmem:[#allocation8 + $0xc4] ss:$12 sps:$4 sm:$0xff]  }
 0x8f0   :  { %2643 = vmatmul.mubr.bf16.vlgmr.msra.gmra.mxu1 %v1056_v32  ;;  %v2879_v32 = vld [vmem:[#allocation8 + $0xc0] ss:$12 sps:$4 sm:$0xff]  }
 0x8f1   :  { %2662 = vmatprep.mubr.msk.bf16.mxu1 %vm3203_vm0, %v3201_v4  ;;  %2647 = vmatpush3.bf16.msra.mxu1 %v2854_v33 }
 0x8f2   :  { %2648 = vmatprep.subr.bf16.mxu1 %v3201_v4 }
 0x8f5   :  { %2649 = vmatpush3.bf16.msra.mxu1 %v2858_v57 }
 0x8f6   :  { %2650 = vmatprep.subr.bf16.mxu1 %v3201_v4 }
 0x8f9   :  { %2651 = vmatpush3.bf16.msra.mxu1 %v2862_v11 }
 0x8fa   :  { %2652 = vmatprep.subr.bf16.mxu1 %v3201_v4 }
 0x8fd   :  { %2653 = vmatpush3.bf16.msra.mxu1 %v2866_v15 }
 0x8fe   :  { %2654 = vmatprep.subr.bf16.mxu1 %v3201_v4 }
 0x901   :  { %2655 = vmatpush3.bf16.msra.mxu1 %v2870_v21 }
 0x902   :  { %2656 = vmatprep.subr.bf16.mxu1 %v3201_v4 }
 0x905   :  { %2657 = vmatpush3.bf16.msra.mxu1 %v2874_v24 }
 0x906   :  { %2658 = vmatprep.subr.bf16.mxu1 %v3201_v4 }
 0x909   :  { %2659 = vmatpush3.bf16.msra.mxu1 %v2878_v27 }
 0x90a   :  { %2660 = vmatprep.subr.bf16.mxu1 %v3201_v4 }
 0x9b0   :  { %v1145_v37 = vpop.f32.mrf.mxu1 }
 0x9b1   :  { %v1146_v38 = vadd.f32 %v2345_v34, %v1145_v37 }
 0x9b2   :  { %v2644_v39 = vpop.f32.mrf.mxu1 }
 0x9b3   :  { %v3555_v42 = vadd.f32 %v1146_v38, %v3517_v49  ;;  %v2855_v49 = vld [vmem:[#allocation8 + $0x150] ss:$12 sps:$4 sm:$0xff]  }
 0x9b4   :  { %v1148_v41 = vpop.f32.mrf.mxu1  ;;  %1361 = vmatpush1.bf16.msra.mxu0 %v2855_v49  ;;  %v2354_v49 = vld [vmem:[%s3732_s6 + $0x3] sm:$0x7] }
 0x9b5   :  { %v1149_v45 = vadd.f32 %v2345_v34, %v1148_v41  ;;  %1154 = vadd.xlane.f32.xlu0 %v3555_v42  ;;  %1362 = vmatprep.subr.bf16.mxu0 %v2861_v9  ;;  %v2882_v34 = vld [vmem:[#allocation8 + $0xc8] ss:$12 sps:$4 sm:$0xff]  }
 0x9b6   :  { %v2645_v44 = vpop.f32.mrf.mxu1  ;;  %2661 = vmatpush3.bf16.msra.mxu1 %v2882_v34 }
 0x9b7   :  { %v3559_v46 = vadd.f32 %v1149_v45, %v3523_v60  ;;  %2686 = vmatprep.subr.bf16.mxu1 %v3201_v4 }
 0x9b8   :  { %1363 = vmatpush1.bf16.msra.mxu0 %v2859_v10 }
 0x9b9   :  { %1156 = vadd.xlane.f32.xlu1 %v3559_v46  ;;  %1364 = vmatprep.subr.bf16.mxu0 %v2865_v12 }
 0x9bc   :  { %1365 = vmatpush1.bf16.msra.mxu0 %v2863_v14 }
 0x9bd   :  { %1366 = vmatprep.subr.bf16.mxu0 %v2869_v17 }
 0x9c0   :  { %1367 = vmatpush1.bf16.msra.mxu0 %v2867_v16 }
 0xa3e   :  { %v1155_v60 = vpop.xlane.xlu0 %1154 }
 0xa3f   :  { %v1158_v58 = vmul.f32 0.03125, %v1155_v60  ;;  %v1218_v60 = vrot.slane %v2354_v49, %v237_v52 }
 0xa41   :  { %v1160_v61 = vsub.f32 %v3555_v42, %v1158_v58 }
 0xa42   :  { %v1157_v62 = vpop.xlane.xlu1 %1156 }
 0xa43   :  { %v1159_v0 = vmul.f32 0.03125, %v1157_v62  ;;  %v1162_v1 = vmul.f32 %v1160_v61, %v1160_v61 }
 0xa45   :  { %v1161_v5 = vsub.f32 %v3559_v46, %v1159_v0  ;;  %v1164_v6 = vmul.f32 %v3332_v13, %v1162_v1  ;;  %v1222_v0 = vrot.slane %v2354_v49, %v241_v55 }
 0xa47   :  { %1166 = vadd.xlane.f32.xlu0 %v1164_v6  ;;  %v1163_v7 = vmul.f32 %v1161_v5, %v1161_v5 }
 0xa49   :  { %v1165_v8 = vmul.f32 %v3332_v13, %v1163_v7  ;;  %v2873_v13 = vld [vmem:[#allocation8 + $0xf4] ss:$12 sps:$4 sm:$0xff]  }
 0xa4a   :  { %1368 = vmatprep.subr.bf16.mxu0 %v2873_v13 }
 0xa4b   :  { %1168 = vadd.xlane.f32.xlu1 %v1165_v8  ;;  %1369 = vmatpush1.bf16.msra.mxu0 %v2871_v23  ;;  %v1226_v8 = vrot.slane %v2354_v49, %v245_v54 }
 0xa4c   :  { %1370 = vmatprep.subr.bf16.mxu0 %v2877_v25 }
 0xa4f   :  { %1371 = vmatpush1.bf16.msra.mxu0 %v2875_v26 }
 0xa50   :  { %1372 = vmatprep.subr.bf16.mxu0 %v2881_v31 }
 0xa53   :  { %1373 = vmatpush1.bf16.msra.mxu0 %v2879_v32 }
 0xad0   :  { %v1167_v37 = vpop.xlane.xlu0 %1166 }
 0xad1   :  { %v1170_v38 = vmul.f32 0.03125, %v1167_v37 }
 0xad3   :  { %v1172_v39 = vadd.f32 1e-05, %v1170_v38 }
 0xad4   :  { %v1169_v41 = vpop.xlane.xlu1 %1168 }
 0xad5   :  { %v1171_v45 = vmul.f32 0.03125, %v1169_v41  ;;  %2959 = vrsqrt.f32 %v1172_v39 }
 0xad7   :  { %v1173_v44 = vadd.f32 1e-05, %v1171_v45 }
 0xad9   :  { %2961 = vrsqrt.f32 %v1173_v44 }
 0xae2   :  { %v2960_v48 = vpop.eup %2959 }
 0xae3   :  { %v1176_v33 = vmul.f32 %v2960_v48, %v1160_v61 }
 0xae6   :  { %v2962_v50 = vpop.eup %2961 }
 0xae7   :  { %v1177_v56 = vmul.f32 %v2962_v50, %v1161_v5 }
 0xae9   :  { %v1213_v57 = vpack.c.bf16 %v1177_v56, %v1176_v33 }
 0xaeb   :  { %1391 = vmatmul.mubr.bf16.vlgmr.msra.gmra.mxu0 %v1213_v57  ;;  %2663 = vmatmul.mubr.bf16.vlgmr.msra.gmra.mxu1 %v1213_v57 }
 0xaec   :  { %2694 = vmatprep.mubr.msk.bf16.mxu1 %vm3203_vm0, %v3201_v4 }
 0xbab   :  { %v1392_v58 = vpop.f32.mrf.mxu0  ;;  %v1435_v62 = vpop.f32.mrf.mxu1 }
 0xbac   :  { %v1393_v5 = vadd.f32 %v1392_v58, %v1218_v60  ;;  %v1436_v17 = vadd.f32 %v1435_v62, %v1226_v8 }
 0xbad   :  { %v1394_v61 = vpop.f32.mrf.mxu0  ;;  %v2664_v1 = vpop.f32.mrf.mxu1 }
 0xbae   :  { %v1395_v10 = vadd.f32 %v1394_v61, %v1222_v0  ;;  %v1442_v52 = vmul.f32 %v1393_v5, %v3364_v2  ;;  %v1444_v23 = vmul.f32 %v1393_v5, %v3386_v20  ;;  %v1446_v24 = vmul.f32 %v1393_v5, %v3393_v22 }
 0xbaf   :  { %v1396_v6 = vpop.f32.mrf.mxu0  ;;  %v1438_v7 = vpop.f32.mrf.mxu1  ;;  %v1448_v26 = vmul.f32 %v1393_v5, %v3407_v29 }
 0xbb0   :  { %v1397_v9 = vadd.f32 %v1396_v6, %v1218_v60  ;;  %v1439_v14 = vadd.f32 %v1438_v7, %v1226_v8 }
 0xbb1   :  { %v1398_v11 = vpop.f32.mrf.mxu0  ;;  %v2665_v12 = vpop.f32.mrf.mxu1 }
 0xbb2   :  { %v1399_v15 = vadd.f32 %v1398_v11, %v1222_v0  ;;  %v1443_v16 = vmul.f32 %v1397_v9, %v3369_v3  ;;  %v1612_v13 = vpack.c.bf16 %v1439_v14, %v1436_v17  ;;  %v1445_v51 = vmul.f32 %v1397_v9, %v3376_v18 }
 0xbb3   :  { %v1447_v54 = vmul.f32 %v1397_v9, %v3381_v19  ;;  %v1449_v3 = vmul.f32 %v1397_v9, %v3402_v28 }
 0xbb4   :  { %v1454_v55 = vpack.c.bf16 %v1399_v15, %v1395_v10  ;;  %v1450_v21 = vpack.c.bf16 %v1443_v16, %v1442_v52  ;;  %v1451_v25 = vpack.c.bf16 %v1445_v51, %v1444_v23 }
 0xbb5   :  { %v1452_v2 = vpack.c.bf16 %v1447_v54, %v1446_v24  ;;  %v1453_v27 = vpack.c.bf16 %v1449_v3, %v1448_v26 }
 0xbb6   :  { %2666 = vmatprep.subr.bf16.mxu0 %v1454_v55  ;;  %2668 = vmatprep.mubr.bf16.mxu0 %v1450_v21 }
 0xbb7   :  { %2667 = vmatpush3.bf16.xpose.msra.mxu0 %v1454_v55 }
 0xbb8   :  { %2676 = vmatprep.subr.bf16.mxu0 %v1612_v13 }
 0xbbe   :  { %2669 = vmatmul.mubr.bf16.vlgmr.msra.gmra.mxu0 %v1451_v25 }
 0xbbf   :  { %2672 = vmatprep.mubr.bf16.mxu0 %v1452_v2  ;;  %2677 = vmatpush3.bf16.msra.mxu0 %v1612_v13 }
 0xbc0   :  { %2698 = vmatprep.subr.bf16.mxu0 %v3201_v4 }
 0xbc6   :  { %2673 = vmatmul.mubr.bf16.gmra.mxu0 %v1453_v27 }
 0xc7e   :  { %v2670_v18 = vpop.f32.mrf.mxu0 }
 0xc7f   :  { %v1498_v22 = vadd.f32 %v2670_v18, %v3421_v36 }
 0xc80   :  { %v1489_v31 = vpop.f32.mrf.mxu0 }
 0xc81   :  { %v1490_v19 = vadd.f32 %v1489_v31, %v3416_v35  ;;  %v1526_v39 = vsel %vm540_vm1, %v1498_v22, -inf }
 0xc82   :  { %v2671_v20 = vpop.f32.mrf.mxu0 }
 0xc83   :  { %v1520_v32 = vsel %vm540_vm1, %v1490_v19, -inf  ;;  %v1501_v38 = vadd.f32 %v2671_v20, %v3434_v43 }
 0xc84   :  { %v1492_v34 = vpop.f32.mrf.mxu0  ;;  %1521 = vmax.xlane.f32.xlu0 %v1520_v32 }
 0xc85   :  { %v1493_v37 = vadd.f32 %v1492_v34, %v3427_v40  ;;  %v1529_v44 = vsel %vm540_vm1, %v1501_v38, -inf }
 0xc86   :  { %v2674_v28 = vpop.f32.mrf.mxu0 }
 0xc87   :  { %v1523_v29 = vsel %vm540_vm1, %v1493_v37, -inf  ;;  %v1514_v36 = vadd.f32 %v2674_v28, %v3448_v53 }
 0xc88   :  { %v1505_v41 = vpop.f32.mrf.mxu0  ;;  %1524 = vmax.xlane.f32.xlu1 %v1523_v29  ;;  %1527 = vmax.xlane.f32.xlu0 %v1526_v39 }
 0xc89   :  { %v1506_v35 = vadd.f32 %v1505_v41, %v3440_v47  ;;  %v1538_v56 = vsel %vm540_vm1, %v1514_v36, -inf }
 0xc8a   :  { %v2675_v45 = vpop.f32.mrf.mxu0 }
 0xc8b   :  { %v1532_v48 = vsel %vm540_vm1, %v1506_v35, -inf  ;;  %v1517_v50 = vadd.f32 %v2675_v45, %v3462_v63 }
 0xc8c   :  { %v1508_v40 = vpop.f32.mrf.mxu0  ;;  %1530 = vmax.xlane.f32.xlu1 %v1529_v44  ;;  %1533 = vmax.xlane.f32.xlu0 %v1532_v48 }
 0xc8d   :  { %v1509_v43 = vadd.f32 %v1508_v40, %v3454_v59  ;;  %v1541_v47 = vsel %vm540_vm1, %v1517_v50, -inf }
 0xc8f   :  { %v1535_v33 = vsel %vm540_vm1, %v1509_v43, -inf }
 0xc90   :  { %1536 = vmax.xlane.f32.xlu1 %v1535_v33  ;;  %1539 = vmax.xlane.f32.xlu0 %v1538_v56 }
 0xc94   :  { %1542 = vmax.xlane.f32.xlu1 %v1541_v47 }
 0xd0d   :  { %v1522_v53 = vpop.xlane.xlu0 %1521 }
 0xd0e   :  { %v1544_v57 = vsub.f32 %v1490_v19, %v1522_v53 }
 0xd10   :  { %v1552_v49 = vmul.f32 1.442695, %v1544_v57 }
 0xd11   :  { %v1525_v60 = vpop.xlane.xlu1 %1524  ;;  %v1528_v58 = vpop.xlane.xlu0 %1527 }
 0xd12   :  { %2963 = vpow2.f32 %v1552_v49  ;;  %v1545_v62 = vsub.f32 %v1493_v37, %v1525_v60  ;;  %v1546_v0 = vsub.f32 %v1498_v22, %v1528_v58 }
 0xd14   :  { %v1554_v59 = vmul.f32 1.442695, %v1545_v62  ;;  %v1556_v61 = vmul.f32 1.442695, %v1546_v0 }
 0xd15   :  { %v1531_v63 = vpop.xlane.xlu1 %1530  ;;  %v1534_v1 = vpop.xlane.xlu0 %1533 }
 0xd16   :  { %2965 = vpow2.f32 %v1554_v59  ;;  %v1547_v5 = vsub.f32 %v1501_v38, %v1531_v63  ;;  %v1548_v6 = vsub.f32 %v1506_v35, %v1534_v1  ;;  %v2884_v63 = vld [vmem:[#allocation9 + $0x70] sm:$0xff]   ;;  %v2885_v1 = vld [vmem:[#allocation9 + $0x68] sm:$0xff]  }
 0xd17   :  { %2967 = vpow2.f32 %v1556_v61  ;;  %v2883_v61 = vld [vmem:[#allocation9 + $0x78] sm:$0xff]  }
 0xd18   :  { %v1558_v7 = vmul.f32 1.442695, %v1547_v5  ;;  %v1560_v8 = vmul.f32 1.442695, %v1548_v6  ;;  %v2886_v5 = vld [vmem:[#allocation9 + $0x60] sm:$0xff]   ;;  %v2887_v6 = vld [vmem:[#allocation9 + $0x58] sm:$0xff]  }
 0xd19   :  { %v1537_v9 = vpop.xlane.xlu1 %1536  ;;  %v1540_v10 = vpop.xlane.xlu0 %1539 }
 0xd1a   :  { %2969 = vpow2.f32 %v1558_v7  ;;  %v1549_v11 = vsub.f32 %v1509_v43, %v1537_v9  ;;  %v1550_v12 = vsub.f32 %v1514_v36, %v1540_v10  ;;  %v2888_v7 = vld [vmem:[#allocation9 + $0x50] sm:$0xff]  }
 0xd1b   :  { %2971 = vpow2.f32 %v1560_v8 }
 0xd1c   :  { %v1562_v14 = vmul.f32 1.442695, %v1549_v11  ;;  %v1564_v15 = vmul.f32 1.442695, %v1550_v12 }
 0xd1d   :  { %v1543_v52 = vpop.xlane.xlu1 %1542 }
 0xd1e   :  { %2973 = vpow2.f32 %v1562_v14  ;;  %v1551_v16 = vsub.f32 %v1517_v50, %v1543_v52  ;;  %v3009_v52 = vld [vmem:[%s3728_s2 + $0x30] sm:$0xff] }
 0xd1f   :  { %v2964_v17 = vpop.eup %2963  ;;  %2975 = vpow2.f32 %v1564_v15 }
 0xd20   :  { %v1566_v55 = vmul.f32 1.442695, %v1551_v16  ;;  %v1568_v21 = vsel %vm540_vm1, %v2964_v17, 0.0 }
 0xd21   :  { %1569 = vadd.xlane.f32.xlu0 %v1568_v21 }
 0xd22   :  { %2977 = vpow2.f32 %v1566_v55 }
 0xd23   :  { %v2966_v13 = vpop.eup %2965 }
 0xd24   :  { %v2968_v51 = vpop.eup %2967  ;;  %v1571_v54 = vsel %vm540_vm1, %v2966_v13, 0.0 }
 0xd25   :  { %1572 = vadd.xlane.f32.xlu1 %v1571_v54  ;;  %v1574_v23 = vsel %vm540_vm1, %v2968_v51, 0.0 }
 0xd26   :  { %1575 = vadd.xlane.f32.xlu0 %v1574_v23  ;;  %v3012_v23 = vld [vmem:[%s3728_s2 + $0x20] sm:$0xff] }
 0xd27   :  { %v2970_v24 = vpop.eup %2969 }
 0xd28   :  { %v2972_v25 = vpop.eup %2971  ;;  %v1577_v2 = vsel %vm540_vm1, %v2970_v24, 0.0 }
 0xd29   :  { %1578 = vadd.xlane.f32.xlu1 %v1577_v2  ;;  %v1580_v3 = vsel %vm540_vm1, %v2972_v25, 0.0 }
 0xd2a   :  { %1581 = vadd.xlane.f32.xlu0 %v1580_v3 }
 0xd2b   :  { %v2974_v26 = vpop.eup %2973 }
 0xd2c   :  { %v2976_v27 = vpop.eup %2975  ;;  %v1583_v18 = vsel %vm540_vm1, %v2974_v26, 0.0 }
 0xd2d   :  { %1584 = vadd.xlane.f32.xlu1 %v1583_v18  ;;  %v1586_v31 = vsel %vm540_vm1, %v2976_v27, 0.0 }
 0xd2e   :  { %1587 = vadd.xlane.f32.xlu0 %v1586_v31  ;;  %v3015_v31 = vld [vmem:[%s3728_s2 + $0x8] sm:$0xff] }
 0xd2f   :  { %v2978_v19 = vpop.eup %2977 }
 0xd30   :  { %v1589_v20 = vsel %vm540_vm1, %v2978_v19, 0.0 }
 0xd31   :  { %1590 = vadd.xlane.f32.xlu1 %v1589_v20  ;;  %v3016_v20 = vld [vmem:[%s3728_s2] sm:$0xff] }
 0xdaa   :  { %v1570_v22 = vpop.xlane.xlu0 %1569 }
 0xdab   :  { %2979 = vrcp.f32 %v1570_v22 }
 0xdae   :  { %v1573_v32 = vpop.xlane.xlu1 %1572 }
 0xdaf   :  { %2981 = vrcp.f32 %v1573_v32  ;;  %v1576_v34 = vpop.xlane.xlu0 %1575 }
 0xdb0   :  { %2983 = vrcp.f32 %v1576_v34  ;;  %v2889_v34 = vld [vmem:[#allocation9 + $0x48] sm:$0xff]  }
 0xdb2   :  { %v1579_v37 = vpop.xlane.xlu1 %1578 }
 0xdb3   :  { %2985 = vrcp.f32 %v1579_v37  ;;  %v1582_v28 = vpop.xlane.xlu0 %1581  ;;  %v2890_v37 = vld [vmem:[#allocation9 + $0x40] sm:$0xff]  }
 0xdb4   :  { %2987 = vrcp.f32 %v1582_v28 }
 0xdb6   :  { %v1585_v38 = vpop.xlane.xlu1 %1584 }
 0xdb7   :  { %2989 = vrcp.f32 %v1585_v38  ;;  %v1588_v29 = vpop.xlane.xlu0 %1587 }
 0xdb8   :  { %2991 = vrcp.f32 %v1588_v29  ;;  %v2980_v39 = vpop.eup %2979 }
 0xdb9   :  { %v1600_v45 = vmul.f32 %v2980_v39, %v2964_v17  ;;  %v3010_v17 = vld [vmem:[%s3728_s2 + $0x38] sm:$0xff] }
 0xdba   :  { %v1591_v41 = vpop.xlane.xlu1 %1590 }
 0xdbb   :  { %2993 = vrcp.f32 %v1591_v41 }
 0xdbc   :  { %v2982_v35 = vpop.eup %2981 }
 0xdbd   :  { %v1601_v36 = vmul.f32 %v2982_v35, %v2966_v13  ;;  %v2984_v44 = vpop.eup %2983 }
 0xdbe   :  { %v1602_v43 = vmul.f32 %v2984_v44, %v2968_v51  ;;  %v3011_v51 = vld [vmem:[%s3728_s2 + $0x28] sm:$0xff] }
 0xdbf   :  { %v1608_v48 = vpack.c.bf16 %v1601_v36, %v1600_v45 }
 0xdc0   :  { %v2986_v40 = vpop.eup %2985 }
 0xdc1   :  { %v1603_v50 = vmul.f32 %v2986_v40, %v2970_v24  ;;  %2678 = vmatprep.mubr.msk.bf16.mxu0 %vm540_vm1, %v1608_v48  ;;  %v2988_v33 = vpop.eup %2987 }
 0xdc2   :  { %v1604_v53 = vmul.f32 %v2988_v33, %v2972_v25  ;;  %v3013_v25 = vld [vmem:[%s3728_s2 + $0x18] sm:$0xff]  ;;  %v2891_v33 = vld [vmem:[#allocation11 + $0x78] sm:$0xff]  }
 0xdc3   :  { %v1609_v56 = vpack.c.bf16 %v1603_v50, %v1602_v43 }
 0xdc4   :  { %v2990_v47 = vpop.eup %2989 }
 0xdc5   :  { %2679 = vmatmul.mubr.msk.bf16.vlgmr.msra.gmra.mxu0 %vm540_vm1, %v1609_v56  ;;  %v1605_v57 = vmul.f32 %v2990_v47, %v2974_v26  ;;  %v2992_v49 = vpop.eup %2991  ;;  %v3014_v26 = vld [vmem:[%s3728_s2 + $0x10] sm:$0xff]  ;;  %v2892_v56 = vld [vmem:[#allocation11 + $0x70] sm:$0xff]  }
 0xdc6   :  { %v1606_v62 = vmul.f32 %v2992_v49, %v2976_v27  ;;  %2699 = vmatpush3.bf16.msra.mxu0 %v2883_v61  ;;  %v2893_v61 = vld [vmem:[#allocation11 + $0x68] sm:$0xff]  }
 0xdc7   :  { %v1610_v60 = vpack.c.bf16 %v1605_v57, %v1604_v53  ;;  %2700 = vmatprep.subr.bf16.mxu0 %v3201_v4 }
 0xdc8   :  { %v2994_v58 = vpop.eup %2993 }
 0xdc9   :  { %2682 = vmatprep.mubr.msk.bf16.mxu0 %vm540_vm1, %v1610_v60  ;;  %v1607_v0 = vmul.f32 %v2994_v58, %v2978_v19  ;;  %v3681_v58 = vld [vmem:[#allocation3] ss:$0 sm:$0xff] }
 0xdca   :  { %2701 = vmatpush3.bf16.msra.mxu0 %v2884_v63  ;;  %v2894_v63 = vld [vmem:[#allocation11 + $0x60] sm:$0xff]  }
 0xdcb   :  { %v1611_v59 = vpack.c.bf16 %v1607_v0, %v1606_v62  ;;  %2702 = vmatprep.subr.bf16.mxu0 %v3201_v4 }
 0xdcd   :  { %2683 = vmatmul.mubr.msk.bf16.gmra.mxu0 %vm540_vm1, %v1611_v59 }
 0xdce   :  { %2714 = vmatprep.mubr.msk.bf16.mxu0 %vm3203_vm0, %v3201_v4  ;;  %2703 = vmatpush3.bf16.msra.mxu0 %v2885_v1  ;;  %v2895_v1 = vld [vmem:[#allocation11 + $0x58] sm:$0xff]  }
 0xdcf   :  { %2704 = vmatprep.subr.bf16.mxu0 %v3201_v4 }
 0xdd2   :  { %2705 = vmatpush3.bf16.msra.mxu0 %v2886_v5  ;;  %v2896_v5 = vld [vmem:[#allocation11 + $0x50] sm:$0xff]  }
 0xdd3   :  { %2706 = vmatprep.subr.bf16.mxu0 %v3201_v4 }
 0xdd6   :  { %2707 = vmatpush3.bf16.msra.mxu0 %v2887_v6  ;;  %v2897_v6 = vld [vmem:[#allocation11 + $0x48] sm:$0xff]  }
 0xdd7   :  { %2708 = vmatprep.subr.bf16.mxu0 %v3201_v4 }
 0xdda   :  { %2709 = vmatpush3.bf16.msra.mxu0 %v2888_v7  ;;  %v2898_v7 = vld [vmem:[#allocation11 + $0x40] sm:$0xff]  }
 0xddb   :  { %2710 = vmatprep.subr.bf16.mxu0 %v3201_v4 }
 0xdde   :  { %2711 = vmatpush3.bf16.msra.mxu0 %v2889_v34 }
 0xddf   :  { %2712 = vmatprep.subr.bf16.mxu0 %v3201_v4 }
 0xde2   :  { %2713 = vmatpush3.bf16.msra.mxu0 %v2890_v37 }
 0xde3   :  { %2738 = vmatprep.subr.bf16.mxu0 %v3201_v4 }
 0xe85   :  { %v2680_v8 = vpop.f32.mrf.mxu0 }
 0xe86   :  { %v1692_v27 = vmul.f32 %v3014_v26, %v2680_v8 }
 0xe87   :  { %v1659_v9 = vpop.f32.mrf.mxu0 }
 0xe88   :  { %v1690_v22 = vmul.f32 %v3016_v20, %v1659_v9 }
 0xe89   :  { %v2681_v10 = vpop.f32.mrf.mxu0 }
 0xe8a   :  { %v1693_v2 = vmul.f32 %v3013_v25, %v2681_v10  ;;  %v2905_v25 = vld [vmem:[#allocation12 + $0x48] sm:$0xff]  }
 0xe8b   :  { %v1662_v11 = vpop.f32.mrf.mxu0 }
 0xe8c   :  { %v1699_v18 = vpack.c.bf16 %v1693_v2, %v1692_v27  ;;  %v1691_v19 = vmul.f32 %v3015_v31, %v1662_v11  ;;  %v2906_v2 = vld [vmem:[#allocation12 + $0x40] sm:$0xff]  }
 0xe8d   :  { %v2684_v12 = vpop.f32.mrf.mxu0 }
 0xe8e   :  { %v1696_v16 = vmul.f32 %v3009_v52, %v2684_v12  ;;  %v1698_v32 = vpack.c.bf16 %v1691_v19, %v1690_v22 }
 0xe8f   :  { %v1675_v14 = vpop.f32.mrf.mxu0 }
 0xe90   :  { %v1694_v24 = vmul.f32 %v3012_v23, %v1675_v14  ;;  %v2903_v23 = vld [vmem:[#allocation12 + $0x58] sm:$0xff]  }
 0xe91   :  { %v2685_v15 = vpop.f32.mrf.mxu0 }
 0xe92   :  { %v1697_v55 = vmul.f32 %v3010_v17, %v2685_v15 }
 0xe93   :  { %v1678_v21 = vpop.f32.mrf.mxu0 }
 0xe94   :  { %v1701_v13 = vpack.c.bf16 %v1697_v55, %v1696_v16  ;;  %v1695_v54 = vmul.f32 %v3011_v51, %v1678_v21  ;;  %v2899_v21 = vld [vmem:[#allocation12 + $0x78] sm:$0xff]   ;;  %v2901_v51 = vld [vmem:[#allocation12 + $0x68] sm:$0xff]  }
 0xe96   :  { %2687 = vmatpush3.bf16.msra.mxu1 %v1701_v13  ;;  %v1700_v3 = vpack.c.bf16 %v1695_v54, %v1694_v24  ;;  %v2900_v13 = vld [vmem:[#allocation12 + $0x70] sm:$0xff]   ;;  %v2902_v54 = vld [vmem:[#allocation12 + $0x60] sm:$0xff]  }
 0xe97   :  { %2688 = vmatprep.subr.bf16.mxu1 %v3201_v4  ;;  %v2904_v24 = vld [vmem:[#allocation12 + $0x50] sm:$0xff]  }
 0xe9a   :  { %2689 = vmatpush3.bf16.msra.mxu1 %v1700_v3  ;;  %v2395_v3 = vld [vmem:[%s3736_s10 + $0x1] ss:$0 sm:$0xff] }
 0xe9b   :  { %2690 = vmatprep.subr.bf16.mxu1 %v3201_v4 }
 0xe9e   :  { %2691 = vmatpush3.bf16.msra.mxu1 %v1699_v18 }
 0xe9f   :  { %2692 = vmatprep.subr.bf16.mxu1 %v3201_v4 }
 0xea2   :  { %2693 = vmatpush3.bf16.msra.mxu1 %v1698_v32 }
 0xea3   :  { %2718 = vmatprep.subr.bf16.mxu1 %v3201_v4 }
 0xea5   :  { %2695 = vmatmul.mubr.msk.bf16.vlgmr.msra.gmra.mxu1 %vm724_vm2, %v3500_v30  ;;  %v2385_v30 = vld [vmem:[%s3734_s8 + $0x1] ss:$0 sm:$0xff] }
 0xea6   :  { %2734 = vmatprep.mubr.msk.bf16.mxu1 %vm3203_vm0, %v3201_v4  ;;  %2719 = vmatpush3.bf16.msra.mxu1 %v2891_v33 }
 0xea7   :  { %2720 = vmatprep.subr.bf16.mxu1 %v3201_v4 }
 0xeaa   :  { %2721 = vmatpush3.bf16.msra.mxu1 %v2892_v56 }
 0xeab   :  { %2722 = vmatprep.subr.bf16.mxu1 %v3201_v4 }
 0xeae   :  { %2723 = vmatpush3.bf16.msra.mxu1 %v2893_v61  ;;  %v2907_v61 = vld [vmem:[#allocation14 + $0x38] sm:$0xff]  }
 0xeaf   :  { %2724 = vmatprep.subr.bf16.mxu1 %v3201_v4 }
 0xeb2   :  { %2725 = vmatpush3.bf16.msra.mxu1 %v2894_v63  ;;  %v2908_v63 = vld [vmem:[#allocation14 + $0x30] sm:$0xff]  }
 0xeb3   :  { %2726 = vmatprep.subr.bf16.mxu1 %v3201_v4 }
 0xeb6   :  { %2727 = vmatpush3.bf16.msra.mxu1 %v2895_v1 }
 0xeb7   :  { %2728 = vmatprep.subr.bf16.mxu1 %v3201_v4 }
 0xeba   :  { %2729 = vmatpush3.bf16.msra.mxu1 %v2896_v5 }
 0xebb   :  { %2730 = vmatprep.subr.bf16.mxu1 %v3201_v4 }
 0xebe   :  { %2731 = vmatpush3.bf16.msra.mxu1 %v2897_v6 }
 0xebf   :  { %2732 = vmatprep.subr.bf16.mxu1 %v3201_v4 }
 0xec2   :  { %2733 = vmatpush3.bf16.msra.mxu1 %v2898_v7 }
 0xec3   :  { %2758 = vmatprep.subr.bf16.mxu1 %v3201_v4 }
 0xf65   :  { %v1736_v28 = vpop.f32.mrf.mxu1 }
 0xf67   :  { %v2696_v38 = vpop.f32.mrf.mxu1 }
 0xf69   :  { %v1739_v29 = vpop.f32.mrf.mxu1 }
 0xf6a   :  { %v1762_v39 = vpack.c.bf16 %v1739_v29, %v1736_v28 }
 0xf6b   :  { %v2697_v41 = vpop.f32.mrf.mxu1 }
 0xf6c   :  { %2715 = vmatmul.mubr.bf16.vlgmr.msra.gmra.mxu0 %v1762_v39 }
 0xf6d   :  { %2754 = vmatprep.mubr.msk.bf16.mxu0 %vm3203_vm0, %v3201_v4  ;;  %2739 = vmatpush3.bf16.msra.mxu0 %v2899_v21 }
 0xf6e   :  { %2740 = vmatprep.subr.bf16.mxu0 %v3201_v4 }
 0xf71   :  { %2741 = vmatpush3.bf16.msra.mxu0 %v2900_v13 }
 0xf72   :  { %2742 = vmatprep.subr.bf16.mxu0 %v3201_v4 }
 0xf75   :  { %2743 = vmatpush3.bf16.msra.mxu0 %v2901_v51 }
 0xf76   :  { %2744 = vmatprep.subr.bf16.mxu0 %v3201_v4 }
 0xf79   :  { %2745 = vmatpush3.bf16.msra.mxu0 %v2902_v54 }
 0xf7a   :  { %2746 = vmatprep.subr.bf16.mxu0 %v3201_v4 }
 0xf7d   :  { %2747 = vmatpush3.bf16.msra.mxu0 %v2903_v23 }
 0xf7e   :  { %2748 = vmatprep.subr.bf16.mxu0 %v3201_v4 }
 0xf81   :  { %2749 = vmatpush3.bf16.msra.mxu0 %v2904_v24 }
 0xf82   :  { %2750 = vmatprep.subr.bf16.mxu0 %v3201_v4 }
 0xf85   :  { %2751 = vmatpush3.bf16.msra.mxu0 %v2905_v25 }
 0xf86   :  { %2752 = vmatprep.subr.bf16.mxu0 %v3201_v4 }
 0xf89   :  { %2753 = vmatpush3.bf16.msra.mxu0 %v2906_v2 }
0x102c   :  { %v1851_v35 = vpop.f32.mrf.mxu0 }
0x102d   :  { %v1852_v45 = vadd.f32 %v2385_v30, %v1851_v35 }
0x102e   :  { %v2716_v36 = vpop.f32.mrf.mxu0 }
0x102f   :  { %v3670_v44 = vadd.f32 %v1852_v45, %v3555_v42 }
0x1030   :  { %v1854_v48 = vpop.f32.mrf.mxu0 }
0x1031   :  { %v1855_v40 = vadd.f32 %v2385_v30, %v1854_v48  ;;  %1860 = vadd.xlane.f32.xlu0 %v3670_v44 }
0x1032   :  { %v2717_v43 = vpop.f32.mrf.mxu0 }
0x1033   :  { %v3674_v50 = vadd.f32 %v1855_v40, %v3559_v46 }
0x1035   :  { %1862 = vadd.xlane.f32.xlu1 %v3674_v50 }
0x10ba   :  { %v1861_v42 = vpop.xlane.xlu0 %1860 }
0x10bb   :  { %v1864_v47 = vmul.f32 0.03125, %v1861_v42 }
0x10bd   :  { %v1866_v53 = vsub.f32 %v3670_v44, %v1864_v47  ;;  %v2405_v47 = vld [vmem:[%s3738_s12 + $0x1] ss:$0 sm:$0xff] }
0x10be   :  { %v1863_v57 = vpop.xlane.xlu1 %1862 }
0x10bf   :  { %v1865_v49 = vmul.f32 0.03125, %v1863_v57  ;;  %v1868_v60 = vmul.f32 %v1866_v53, %v1866_v53 }
0x10c1   :  { %v1867_v46 = vsub.f32 %v3674_v50, %v1865_v49  ;;  %v1870_v62 = vmul.f32 %v3681_v58, %v1868_v60 }
0x10c3   :  { %1872 = vadd.xlane.f32.xlu0 %v1870_v62  ;;  %v1869_v0 = vmul.f32 %v1867_v46, %v1867_v46 }
0x10c5   :  { %v1871_v59 = vmul.f32 %v3681_v58, %v1869_v0 }
0x10c7   :  { %1874 = vadd.xlane.f32.xlu1 %v1871_v59 }
0x114c   :  { %v1873_v8 = vpop.xlane.xlu0 %1872 }
0x114d   :  { %v1876_v9 = vmul.f32 0.03125, %v1873_v8 }
0x114f   :  { %v1878_v10 = vadd.f32 1e-05, %v1876_v9 }
0x1150   :  { %v1875_v11 = vpop.xlane.xlu1 %1874 }
0x1151   :  { %v1877_v12 = vmul.f32 0.03125, %v1875_v11  ;;  %2995 = vrsqrt.f32 %v1878_v10 }
0x1153   :  { %v1879_v14 = vadd.f32 1e-05, %v1877_v12  ;;  %v2909_v12 = vld [vmem:[#allocation14 + $0x28] sm:$0xff]  }
0x1155   :  { %2997 = vrsqrt.f32 %v1879_v14  ;;  %v2910_v14 = vld [vmem:[#allocation14 + $0x20] sm:$0xff]  }
0x115e   :  { %v2996_v15 = vpop.eup %2995 }
0x115f   :  { %v1882_v16 = vmul.f32 %v2996_v15, %v1866_v53  ;;  %v2911_v15 = vld [vmem:[#allocation14 + $0x18] sm:$0xff]  }
0x1162   :  { %v2998_v52 = vpop.eup %2997 }
0x1163   :  { %v1883_v17 = vmul.f32 %v2998_v52, %v1867_v46  ;;  %v2912_v52 = vld [vmem:[#allocation14 + $0x10] sm:$0xff]  }
0x1165   :  { %v1903_v55 = vpack.c.bf16 %v1883_v17, %v1882_v16  ;;  %v2913_v16 = vld [vmem:[#allocation14 + $0x8] sm:$0xff]  }
0x1167   :  { %2735 = vmatmul.mubr.bf16.vlgmr.msra.gmra.mxu1 %v1903_v55 }
0x1168   :  { %2774 = vmatprep.mubr.msk.bf16.mxu1 %vm3203_vm0, %v3201_v4  ;;  %2759 = vmatpush3.bf16.msra.mxu1 %v2907_v61 }
0x1169   :  { %2760 = vmatprep.subr.bf16.mxu1 %v3201_v4 }
0x116c   :  { %2761 = vmatpush3.bf16.msra.mxu1 %v2908_v63 }
0x116d   :  { %2762 = vmatprep.subr.bf16.mxu1 %v3201_v4 }
0x1170   :  { %2763 = vmatpush3.bf16.msra.mxu1 %v2909_v12 }
0x1171   :  { %2764 = vmatprep.subr.bf16.mxu1 %v3201_v4 }
0x1174   :  { %2765 = vmatpush3.bf16.msra.mxu1 %v2910_v14 }
0x1175   :  { %2766 = vmatprep.subr.bf16.mxu1 %v3201_v4 }
0x1178   :  { %2767 = vmatpush3.bf16.msra.mxu1 %v2911_v15 }
0x1179   :  { %2768 = vmatprep.subr.bf16.mxu1 %v3201_v4 }
0x117c   :  { %2769 = vmatpush3.bf16.msra.mxu1 %v2912_v52 }
0x117d   :  { %2770 = vmatprep.subr.bf16.mxu1 %v3201_v4 }
0x1180   :  { %2771 = vmatpush3.bf16.msra.mxu1 %v2913_v16 }
0x1181   :  { %2772 = vmatprep.subr.bf16.mxu1 %v3201_v4 }
0x1227   :  { %v1992_v26 = vpop.f32.mrf.mxu1 }
0x1228   :  { %v1993_v27 = vadd.f32 %v2395_v3, %v1992_v26  ;;  %v2414_v26 = vld [vmem:[%s3740_s14] ss:$0 sm:$0xff] }
0x1229   :  { %v2736_v18 = vpop.f32.mrf.mxu1 }
0x122a   :  { %v2001_v31 = vmul.f32 0.044715, %v1993_v27  ;;  %v1999_v48 = vmul.f32 0.5, %v1993_v27 }
0x122b   :  { %v1995_v19 = vpop.f32.mrf.mxu1 }
0x122c   :  { %v2003_v20 = vmul.f32 %v2001_v31, %v1993_v27  ;;  %v1996_v22 = vadd.f32 %v2395_v3, %v1995_v19 }
0x122d   :  { %v2737_v32 = vpop.f32.mrf.mxu1 }
0x122e   :  { %v2005_v34 = vmul.f32 %v2003_v20, %v1993_v27  ;;  %v2002_v37 = vmul.f32 0.044715, %v1996_v22  ;;  %v2000_v40 = vmul.f32 0.5, %v1996_v22 }
0x1230   :  { %v2007_v28 = vadd.f32 %v2005_v34, %v1993_v27  ;;  %v2004_v38 = vmul.f32 %v2002_v37, %v1996_v22 }
0x1232   :  { %v2009_v29 = vmul.f32 0.7978846, %v2007_v28  ;;  %v2006_v39 = vmul.f32 %v2004_v38, %v1996_v22 }
0x1234   :  { %2999 = vtanh.f32 %v2009_v29  ;;  %v2008_v41 = vadd.f32 %v2006_v39, %v1996_v22 }
0x1236   :  { %v2010_v30 = vmul.f32 0.7978846, %v2008_v41 }
0x1238   :  { %3001 = vtanh.f32 %v2010_v30 }
0x1241   :  { %v3000_v35 = vpop.eup %2999 }
0x1242   :  { %v2013_v45 = vadd.f32 1.0, %v3000_v35 }
0x1244   :  { %v2015_v33 = vmul.f32 %v2013_v45, %v1999_v48 }
0x1245   :  { %v3002_v36 = vpop.eup %3001 }
0x1246   :  { %v2014_v43 = vadd.f32 1.0, %v3002_v36 }
0x1248   :  { %v2016_v56 = vmul.f32 %v2014_v43, %v2000_v40 }
0x124a   :  { %v2036_v42 = vpack.c.bf16 %v2016_v56, %v2015_v33 }
0x124c   :  { %2755 = vmatmul.mubr.bf16.vlgmr.msra.gmra.mxu0 %v2036_v42 }
0x130c   :  { %v2125_v53 = vpop.f32.mrf.mxu0 }
0x130d   :  { %v2126_v57 = vadd.f32 %v2405_v47, %v2125_v53 }
0x130e   :  { %v2756_v49 = vpop.f32.mrf.mxu0 }
0x130f   :  { %v2132_v60 = vadd.f32 %v2126_v57, %v3670_v44 }
0x1310   :  { %v2128_v46 = vpop.f32.mrf.mxu0 }
0x1311   :  { %v2129_v62 = vadd.f32 %v2405_v47, %v2128_v46  ;;  %2134 = vadd.xlane.f32.xlu0 %v2132_v60 }
0x1312   :  { %v2757_v0 = vpop.f32.mrf.mxu0 }
0x1313   :  { %v2133_v59 = vadd.f32 %v2129_v62, %v3674_v50 }
0x1315   :  { %2136 = vadd.xlane.f32.xlu1 %v2133_v59 }
0x139a   :  { %v2135_v1 = vpop.xlane.xlu0 %2134 }
0x139b   :  { %v2138_v5 = vmul.f32 0.03125, %v2135_v1 }
0x139d   :  { %v2140_v6 = vsub.f32 %v2132_v60, %v2138_v5 }
0x139e   :  { %v2137_v7 = vpop.xlane.xlu1 %2136 }
0x139f   :  { %v2139_v44 = vmul.f32 0.03125, %v2137_v7  ;;  %v2142_v8 = vmul.f32 %v2140_v6, %v2140_v6 }
0x13a1   :  { %v2141_v9 = vsub.f32 %v2133_v59, %v2139_v44  ;;  %v2144_v10 = vmul.f32 %v3681_v58, %v2142_v8 }
0x13a3   :  { %2146 = vadd.xlane.f32.xlu0 %v2144_v10  ;;  %v2143_v50 = vmul.f32 %v2141_v9, %v2141_v9 }
0x13a5   :  { %v2145_v11 = vmul.f32 %v3681_v58, %v2143_v50  ;;  %v2914_v58 = vld [vmem:[#allocation14] sm:$0xff]  }
0x13a6   :  { %2773 = vmatpush3.bf16.msra.mxu1 %v2914_v58 }
0x13a7   :  { %2148 = vadd.xlane.f32.xlu1 %v2145_v11 }
0x142c   :  { %v2147_v17 = vpop.xlane.xlu0 %2146 }
0x142d   :  { %v2150_v55 = vmul.f32 0.03125, %v2147_v17 }
0x142f   :  { %v2152_v21 = vadd.f32 1e-05, %v2150_v55 }
0x1430   :  { %v2149_v13 = vpop.xlane.xlu1 %2148 }
0x1431   :  { %v2151_v51 = vmul.f32 0.03125, %v2149_v13  ;;  %3003 = vrsqrt.f32 %v2152_v21 }
0x1433   :  { %v2153_v54 = vadd.f32 1e-05, %v2151_v51 }
0x1435   :  { %3005 = vrsqrt.f32 %v2153_v54 }
0x143e   :  { %v3004_v23 = vpop.eup %3003 }
0x143f   :  { %v2156_v25 = vmul.f32 %v3004_v23, %v2140_v6 }
0x1442   :  { %v3006_v24 = vpop.eup %3005 }
0x1443   :  { %v2157_v2 = vmul.f32 %v3006_v24, %v2141_v9 }
0x1445   :  { %v2179_v3 = vpack.c.bf16 %v2157_v2, %v2156_v25 }
0x1447   :  { %2775 = vmatmul.mubr.bf16.vlgmr.msra.gmra.mxu1 %v2179_v3 }
0x1507   :  { %v2268_v4 = vpop.f32.mrf.mxu1 }
0x1508   :  { %v2269_v27 = vadd.f32 %v2414_v26, %v2268_v4 }
0x1509   :  { %v2776_v18 = vpop.f32.mrf.mxu1 }
0x150a   :  { %2275 = vst [vmem:[#allocation15] sm:$0xff] %v2269_v27 }
0x150b   :  { %v2271_v31 = vpop.f32.mrf.mxu1 }
0x150c   :  { %v2272_v19 = vadd.f32 %v2414_v26, %v2271_v31 }
0x150d   :  { %v2777_v20 = vpop.f32.mrf.mxu1 }
0x150e   :  { %2276 = vst [vmem:[#allocation15 + $0x8] sm:$0xff] %v2272_v19 }
0x150f   :  { %3169 = shalt.err (!%p3166_p11)
}
0x1510   :  { %2288 = dma.vmem_to_hbm [thread:$0]  %s2283_s29, 256, %s3741_s15, [#allocation5], %s3189_s21, %s3189_s21, %s3190_s22  }
0x1511   :  { %3186 = dma.done.wait [#allocation5], 256  }
0x1512   :  { %3187 = vsyncadd [#allocation5], 4294967040 }
0x1513   :  { %2292 = vsyncpa [#allocation4], 1 }
0x1514   :  { %2293 = vsyncpa [#allocation7], 1 }
0x1515   :  { %2294 = vsyncpa [#allocation10], 1 }
0x1516   :  { %2295 = vsyncpa [#allocation13], 1 }
0x1517   :  { %2296 = vsyncpa [#allocation5], 1 }

</bundles_post_ra>
